<compile_context>
chip_gen: v6e
topology: v6e:2x2x1
jax: 0.10.0
libtpu: 0.0.40
codegen_flags: <defaults>
</compile_context>

<pallas_src>
import math
import functools

import jax
import jax.numpy as jnp
from jax import lax
from jax.experimental import pallas as pl
from jax.experimental.pallas import tpu as pltpu


# ---------------------------------------------------------------------------
# chip-aware knobs
# ---------------------------------------------------------------------------
@functools.lru_cache(maxsize=None)
def _vmem_limit_bytes():
    """Raise the scoped-VMEM limit above the (16/32 MiB) defaults, per chip."""
    cap = 64 * 1024 * 1024                       # conservative fallback (v7x)
    try:
        cap = int(pltpu.get_tpu_info().vmem_capacity_bytes)
    except Exception:
        pass
    return max(16 * 1024 * 1024, min(96 * 1024 * 1024, (cap * 4) // 5))


def _qt_cap():
    # v7x (64 MiB VMEM): 128-row q-tiles; v5e/v6e (128 MiB): 256-row q-tiles.
    return 256 if _vmem_limit_bytes() >= 90 * 1024 * 1024 else 128


def _tile(n, cap):
    """Largest multiple-of-8 divisor of n that is <= cap (else n itself)."""
    t = min(cap, n)
    t -= t % 8
    while t >= 8:
        if n % t == 0:
            return t
        t -= 8
    return n


def _mosaic(*sem):
    return pltpu.CompilerParams(dimension_semantics=sem,
                                vmem_limit_bytes=_vmem_limit_bytes())


# ---------------------------------------------------------------------------
# helpers used inside kernels
# ---------------------------------------------------------------------------
def _ln(x, g, b, eps=1e-5):
    """torch.nn.LayerNorm semantics (biased variance, eps=1e-5, affine)."""
    mu = jnp.mean(x, axis=-1, keepdims=True)
    xc = x - mu
    var = jnp.mean(xc * xc, axis=-1, keepdims=True)
    return (xc * lax.rsqrt(var + eps)) * g + b


def _erf(x):
    # Abramowitz & Stegun 7.1.26 (|err| < 1.5e-7): keeps exact-erf GELU parity.
    a1, a2, a3, a4, a5 = (0.254829592, -0.284496736, 1.421413741,
                          -1.453152027, 1.061405429)
    p = 0.3275911
    sgn = jnp.where(x >= 0.0, 1.0, -1.0)
    ax = jnp.abs(x)
    t = 1.0 / (1.0 + p * ax)
    poly = ((((a5 * t + a4) * t + a3) * t + a2) * t + a1) * t
    return sgn * (1.0 - poly * jnp.exp(-ax * ax))


def _gelu(x):  # matches torch.nn.GELU() (exact erf form) to ~1e-7
    return 0.5 * x * (1.0 + _erf(x * (1.0 / math.sqrt(2.0))))


# ---------------------------------------------------------------------------
# norm1 + qkv projection: row-tiled, resident bf16 weights, bf16 lane-dense out
# ---------------------------------------------------------------------------
def _ln_linear_kernel(x_ref, g_ref, b_ref, w_ref, bias_ref, o_ref):
    y = _ln(x_ref[...], g_ref[...], b_ref[...])
    o_ref[...] = (jnp.dot(y.astype(jnp.bfloat16), w_ref[...],
                          preferred_element_type=jnp.float32)
                  + bias_ref[...]).astype(o_ref.dtype)


def ln_linear(x2d, g, b, w, bias, out_dtype=jnp.bfloat16):
    R, C = x2d.shape
    O = w.shape[1]
    rt = _tile(R, 256)
    return pl.pallas_call(
        _ln_linear_kernel,
        out_shape=jax.ShapeDtypeStruct((R, O), out_dtype),
        grid=(R // rt,),
        in_specs=[
            pl.BlockSpec((rt, C), lambda i: (i, 0)),
            pl.BlockSpec((1, C), lambda i: (0, 0)),
            pl.BlockSpec((1, C), lambda i: (0, 0)),
            pl.BlockSpec((C, O), lambda i: (0, 0)),      # weights stay resident
            pl.BlockSpec((1, O), lambda i: (0, 0)),
        ],
        out_specs=pl.BlockSpec((rt, O), lambda i: (i, 0)),
        compiler_params=_mosaic("parallel"),
    )(x2d, g, b, w, bias)


# ---------------------------------------------------------------------------
# fused proj + residual + norm2 + MLP(GELU) + residual (one HBM round trip)
# ---------------------------------------------------------------------------
def _proj_mlp_kernel(attn_ref, x_ref, pw_ref, pb_ref, g2_ref, bt2_ref,
                     w1_ref, b1_ref, w2_ref, b2_ref, o_ref):
    # x = x + attn @ W_proj + b_proj    (proj_drop / ls1 / drop_path1 identity)
    y = (x_ref[...]
         + jnp.dot(attn_ref[...], pw_ref[...],
                   preferred_element_type=jnp.float32)
         + pb_ref[...])
    # x = x + fc2(GELU(fc1(norm2(x))))  (mlp drop / ls2 / drop_path2 identity)
    h = _ln(y, g2_ref[...], bt2_ref[...])
    h = jnp.dot(h.astype(jnp.bfloat16), w1_ref[...],
                preferred_element_type=jnp.float32) + b1_ref[...]
    h = _gelu(h)
    o_ref[...] = (y
                  + jnp.dot(h.astype(jnp.bfloat16), w2_ref[...],
                            preferred_element_type=jnp.float32)
                  + b2_ref[...])


def proj_mlp_residual(attn2d, x2d, pw, pb, g2, bt2, w1, b1, w2, b2):
    R, C = x2d.shape
    Hd = w1.shape[1]
    rt = _tile(R, 256)
    return pl.pallas_call(
        _proj_mlp_kernel,
        out_shape=jax.ShapeDtypeStruct((R, C), jnp.float32),
        grid=(R // rt,),
        in_specs=[
            pl.BlockSpec((rt, C), lambda i: (i, 0)),     # attn output (bf16)
            pl.BlockSpec((rt, C), lambda i: (i, 0)),     # residual x (f32)
            pl.BlockSpec((C, C), lambda i: (0, 0)),      # proj W (bf16, resident)
            pl.BlockSpec((1, C), lambda i: (0, 0)),
            pl.BlockSpec((1, C), lambda i: (0, 0)),
            pl.BlockSpec((1, C), lambda i: (0, 0)),
            pl.BlockSpec((C, Hd), lambda i: (0, 0)),     # fc1 W (bf16, resident)
            pl.BlockSpec((1, Hd), lambda i: (0, 0)),
            pl.BlockSpec((Hd, C), lambda i: (0, 0)),     # fc2 W (bf16, resident)
            pl.BlockSpec((1, C), lambda i: (0, 0)),
        ],
        out_specs=pl.BlockSpec((rt, C), lambda i: (i, 0)),
        compiler_params=_mosaic("parallel"),
    )(attn2d, x2d, pw, pb, g2, bt2, w1, b1, w2, b2)


# ---------------------------------------------------------------------------
# dense masked spatial attention: grid over (batch, query-tile)
# ---------------------------------------------------------------------------
def _spatial_attn_kernel(lam_ref, qkv_ref, knb_ref, dist_ref, r1_ref, r2_ref,
                         o_ref, *, num_heads, head_dim, k_h, q_tile):
    C = num_heads * head_dim
    inv_sigma = 1.0 / math.sqrt(head_dim)
    row0 = pl.multiple_of(pl.program_id(1) * q_tile, q_tile)

    # per-tile, head-independent loads / casts (hoisted out of the head loop)
    dist = dist_ref[...].astype(jnp.float32)     # (qt, N) cls-padded distance
    r1 = r1_ref[...].astype(jnp.int32)           # first-occurrence rank (N = never)
    r2 = r2_ref[...].astype(jnp.int32)           # second-occurrence rank

    dn = (((1,), (1,)), ((), ()))                # contract last dims: q @ k^T

    for h in range(num_heads):                   # unrolled; H is small & static
        lam = lam_ref[h]                         # synthetic DecayNetwork rate
        K_h = k_h[h]                             # static per-head neighbour count

        q = qkv_ref[pl.ds(row0, q_tile), pl.ds(h * head_dim, head_dim)]   # (qt,d) bf16
        k = qkv_ref[:, pl.ds(C + h * head_dim, head_dim)]                 # (N, d) bf16
        v = qkv_ref[:, pl.ds(2 * C + h * head_dim, head_dim)]             # (N, d) bf16

        # scores = (q.k - 0.5*(|q|^2 + |k|^2)) / sqrt(d); key-norm bias is the
        # precomputed resident (1, N) row, no broadcast matmul.
        qk = lax.dot_general(q, k, dn, preferred_element_type=jnp.float32)  # (qt,N)
        qf = q.astype(jnp.float32)
        qn = jnp.sum(qf * qf, axis=-1, keepdims=True)                       # (qt,1)
        kb = knb_ref[pl.ds(h, 1), :]                                        # (1, N)
        s = qk * inv_sigma - (0.5 * inv_sigma) * qn + kb

        # softmax with the decay prior and the spatial-pruning count folded
        # multiplicatively into the numerator:
        #   p_j = exp(s_j - max s) * (exp(-lam*d_j) + 1e-6) * cnt_j
        # cnt_j = #times key j appears in indices[:, :, :K_h] (the duplicated
        # cls index 0 counts twice) -- identical to gather + softmax + sum.
        decay = jnp.exp(-lam * dist) + 1e-6
        cnt = (r1 < K_h).astype(jnp.float32) + (r2 < K_h).astype(jnp.float32)
        m = jnp.max(s, axis=-1, keepdims=True)
        p = jnp.exp(s - m) * (decay * cnt)
        l = jnp.sum(p, axis=-1, keepdims=True)

        out_h = jnp.dot(p.astype(jnp.bfloat16), v,
                        preferred_element_type=jnp.float32)                 # (qt,d)
        out_h = out_h * pl.reciprocal(l, approx=False)
        # stream each head straight into the merged-head output (no concat)
        o_ref[:, pl.ds(h * head_dim, head_dim)] = out_h.astype(o_ref.dtype)


def spatial_attention(qkv, knb, dist, r1, r2, lam, k_h, *, num_heads, head_dim):
    B, N, _ = qkv.shape
    C = num_heads * head_dim
    qt = _tile(N, _qt_cap())                     # divisor search, chip-capped
    nq = N // qt

    kernel = functools.partial(_spatial_attn_kernel, num_heads=num_heads,
                               head_dim=head_dim, k_h=tuple(k_h), q_tile=qt)
    in_bytes = (qkv.size * qkv.dtype.itemsize + knb.size * 4
                + dist.size * dist.dtype.itemsize
                + r1.size * r1.dtype.itemsize + r2.size * r2.dtype.itemsize)
    cost = pl.CostEstimate(
        flops=int(4 * B * num_heads * N * N * head_dim),
        transcendentals=int(2 * B * num_heads * N * N),
        bytes_accessed=int(in_bytes + 2 * B * N * C),
    )
    return pl.pallas_call(
        kernel,
        out_shape=jax.ShapeDtypeStruct((B, N, C), jnp.bfloat16),
        grid=(B, nq),
        in_specs=[
            pl.BlockSpec(memory_space=pltpu.MemorySpace.SMEM),            # lam (H,)
            pl.BlockSpec((None, N, 3 * C), lambda b, qi: (b, 0, 0)),      # qkv (resident, bf16)
            pl.BlockSpec((None, num_heads, N), lambda b, qi: (b, 0, 0)),  # key-norm bias
            pl.BlockSpec((None, qt, N), lambda b, qi: (b, qi, 0)),        # dist (bf16)
            pl.BlockSpec((None, qt, N), lambda b, qi: (b, qi, 0)),        # r1 (int16)
            pl.BlockSpec((None, qt, N), lambda b, qi: (b, qi, 0)),        # r2 (int16)
        ],
        out_specs=pl.BlockSpec((None, qt, C), lambda b, qi: (b, qi, 0)),
        # batch parallel, q-tiles serial: keeps the resident qkv block from
        # being re-DMA'd per core when the 2-TC chips shard the grid.
        compiler_params=_mosaic("parallel", "arbitrary"),
        cost_estimate=cost,
    )(lam, qkv, knb, dist, r1, r2)


# ---------------------------------------------------------------------------
# wrapper-side precompute: first/second occurrence-rank maps from `indices`
# (head-independent; the per-head gather indices[:, :, :K_h] becomes rank < K_h)
# ---------------------------------------------------------------------------
def _build_rank_maps(idx_sel, n_keys):
    # idx_sel: (B, N, K) int32 (cls-padded, truncated to k_max), values in [0, n_keys).
    # Counts are capped at 2 -- exact for argsort-style indices where only the
    # cls-padded index 0 repeats (and a >2-fold repeat only happens in the cls
    # row, where it cancels in the softmax).
    B, Nq, K = idx_sel.shape
    big = jnp.int32(K)                                   # K_h <= K  =>  "never selected"
    ranks = jnp.broadcast_to(jnp.arange(K, dtype=jnp.int32), (B, Nq, K))
    b_ix = jnp.arange(B, dtype=jnp.int32)[:, None, None]
    n_ix = jnp.arange(Nq, dtype=jnp.int32)[None, :, None]
    base = jnp.full((B, Nq, n_keys), big, jnp.int32)
    r1 = base.at[b_ix, n_ix, idx_sel].min(ranks)
    first = jnp.take_along_axis(r1, idx_sel, axis=-1)
    r2 = base.at[b_ix, n_ix, idx_sel].min(jnp.where(ranks == first, big, ranks))
    dt = jnp.int16 if K < (1 << 15) else jnp.int32       # narrow ranks (review #5)
    return r1.astype(dt), r2.astype(dt)


# ---------------------------------------------------------------------------
# parameters (deterministic synthetic init; torch Linear y = x @ W + b with
# W stored as (in, out))
# ---------------------------------------------------------------------------
def init_params(key, dim, num_heads, mlp_ratio=4.0):
    hidden = int(dim * mlp_ratio)
    ks = jax.random.split(key, 8)
    s = 0.02
    return dict(
        norm1_g=jnp.ones((1, dim), jnp.float32),
        norm1_b=jnp.zeros((1, dim), jnp.float32),
        qkv_w=s * jax.random.normal(ks[0], (dim, 3 * dim), jnp.float32),
        qkv_b=s * jax.random.normal(ks[1], (1, 3 * dim), jnp.float32),
        proj_w=s * jax.random.normal(ks[2], (dim, dim), jnp.float32),
        proj_b=s * jax.random.normal(ks[3], (1, dim), jnp.float32),
        norm2_g=jnp.ones((1, dim), jnp.float32),
        norm2_b=jnp.zeros((1, dim), jnp.float32),
        fc1_w=s * jax.random.normal(ks[4], (dim, hidden), jnp.float32),
        fc1_b=s * jax.random.normal(ks[5], (1, hidden), jnp.float32),
        fc2_w=s * jax.random.normal(ks[6], (hidden, dim), jnp.float32),
        fc2_b=s * jax.random.normal(ks[7], (1, dim), jnp.float32),
        # synthetic per-head decay rates (see TODO(synk) above)
        decay_lam=(0.1 + 0.1 * jnp.arange(num_heads, dtype=jnp.float32)),
    )


# ---------------------------------------------------------------------------
# SpatialBlock forward (eval mode: dropouts / droppath / LayerScale = identity)
# ---------------------------------------------------------------------------
def spatial_block_forward(params, x, distance, indices, k_h_list):
    B, N, C = x.shape
    H = params["decay_lam"].shape[0]
    hd = C // H

    # pool_type == 'cls_token': prepend zero row/col to distance and indices.
    # (Indices are intentionally NOT shifted: the torch reference gathers q/k/v
    #  with the un-shifted argsort values after padding.)
    dist_p = jnp.pad(distance.astype(jnp.float32), ((0, 0), (1, 0), (1, 0)))
    idx_p = jnp.pad(indices.astype(jnp.int32), ((0, 0), (1, 0), (1, 0)))

    # TODO(synk): K_h == 0 is clamped to 1 (torch would softmax an empty gather).
    k_h = tuple(max(1, min(int(v), N)) for v in k_h_list)
    k_max = max(k_h)
    r1, r2 = _build_rank_maps(idx_p[:, :, :k_max], N)

    # bf16 copies of the matmul weights (MXU-native); biases, LN and all
    # element-wise math stay in f32.
    qkv_w = params["qkv_w"].astype(jnp.bfloat16)
    proj_w = params["proj_w"].astype(jnp.bfloat16)
    fc1_w = params["fc1_w"].astype(jnp.bfloat16)
    fc2_w = params["fc2_w"].astype(jnp.bfloat16)

    x2d = x.reshape(B * N, C)

    # norm1 + qkv projection (fused, row-tiled); bf16 output feeds attention
    qkv2d = ln_linear(x2d, params["norm1_g"], params["norm1_b"], qkv_w,
                      params["qkv_b"], out_dtype=jnp.bfloat16)
    qkv = qkv2d.reshape(B, N, 3 * C)             # contiguous reshape, no transpose

    # per-head key-norm bias  -0.5*|k_j|^2/sqrt(d), precomputed once (tiny)
    kf = qkv[:, :, C:2 * C].astype(jnp.float32).reshape(B, N, H, hd)
    knb = jnp.transpose((-0.5 / math.sqrt(hd)) * jnp.sum(kf * kf, axis=-1),
                        (0, 2, 1))               # (B, H, N) f32

    # spatially-pruned full-posterior attention (dense masked, merged-head out)
    attn = spatial_attention(qkv, knb, dist_p.astype(jnp.bfloat16), r1, r2,
                             params["decay_lam"], k_h, num_heads=H, head_dim=hd)
    attn2d = attn.reshape(B * N, C)              # contiguous reshape, no transpose

    # fused: attn.proj + residual + norm2 + MLP(GELU) + residual
    out = proj_mlp_residual(attn2d, x2d, proj_w, params["proj_b"],
                            params["norm2_g"], params["norm2_b"],
                            fc1_w, params["fc1_b"], fc2_w, params["fc2_b"])

    return out.reshape(B, N, C), distance, indices, None, None, ()


if __name__ == "__main__":
    B, seq, C, H = 2, 15, 32, 4
    N = seq + 1  # + cls token

    key = jax.random.PRNGKey(0)
    k_x, k_pts, k_params = jax.random.split(key, 3)

    x = jax.random.normal(k_x, (B, N, C), jnp.float32)
    pts = jax.random.uniform(k_pts, (B, seq, 2), jnp.float32) * 10.0
    diff = pts[:, :, None, :] - pts[:, None, :, :]
    distance = jnp.sqrt(jnp.sum(diff * diff, axis=-1))            # (B, seq, seq)
    indices = jnp.argsort(distance, axis=-1).astype(jnp.int32)    # nearest first

    params = init_params(k_params, C, H)

    # synthetic per-head local radius -> K_h = round(pi * local_k^2) (clipped to N)
    local_k = [1.0 + 0.3 * h for h in range(H)]
    k_h_list = tuple(min(N, max(1, int(round(math.pi * lk ** 2)))) for lk in local_k)

    fwd = jax.jit(functools.partial(spatial_block_forward, k_h_list=k_h_list))
    out, *_ = fwd(params, x, distance, indices)
    jax.block_until_ready(out)
    assert out.shape == (B, N, C)
    assert bool(jnp.all(jnp.isfinite(out)))
    print("KERNEL_OK")
</pallas_src>

<mosaic_0001>
module attributes {stable_mosaic.version = 11 : i64} {
  func.func private @main(%arg0: i32) attributes {dimension_semantics = [#tpu.dimension_semantics<core_parallel>], iteration_bounds = array<i64: 2>, tpu.core_type = #tpu.core_type<sc_scalar_subcore>, window_params = []} {
    return
  }
}

module attributes {stable_mosaic.version = 11 : i64} {
  func.func private @main(%arg0: i32) attributes {dimension_semantics = [#tpu.dimension_semantics<core_parallel>], iteration_bounds = array<i64: 2>, tpu.core_type = #tpu.core_type<sc_scalar_subcore>, window_params = []} {
    return
  }
}

module attributes {stable_mosaic.version = 11 : i64} {
  func.func @_ln_linear_kernel(%arg0: i32, %arg1: memref<32x32xf32, #tpu.memory_space<vmem>>, %arg2: memref<1x32xf32, #tpu.memory_space<vmem>>, %arg3: memref<1x32xf32, #tpu.memory_space<vmem>>, %arg4: memref<32x96xbf16, #tpu.memory_space<vmem>>, %arg5: memref<1x96xf32, #tpu.memory_space<vmem>>, %arg6: memref<32x96xbf16, #tpu.memory_space<vmem>>) attributes {dimension_semantics = [#tpu.dimension_semantics<parallel>], iteration_bounds = array<i64: 1>, scalar_prefetch = 0 : i64, scratch_operands = 0 : i64, tpu.core_type = #tpu.core_type<tc>, window_params = [{transform_indices = @transform_0, window_bounds = array<i64: 32, 32>}, {pipeline_mode = #tpu.pipeline_mode<synchronous>, transform_indices = @transform_1, window_bounds = array<i64: 1, 32>}, {pipeline_mode = #tpu.pipeline_mode<synchronous>, transform_indices = @transform_2, window_bounds = array<i64: 1, 32>}, {pipeline_mode = #tpu.pipeline_mode<synchronous>, transform_indices = @transform_3, window_bounds = array<i64: 32, 96>}, {pipeline_mode = #tpu.pipeline_mode<synchronous>, transform_indices = @transform_4, window_bounds = array<i64: 1, 96>}, {transform_indices = @transform_5, window_bounds = array<i64: 32, 96>}]} {
    %c0 = arith.constant 0 : index
    %c0_0 = arith.constant 0 : index
    %0 = vector.load %arg1[%c0, %c0_0] : memref<32x32xf32, #tpu.memory_space<vmem>>, vector<32x32xf32>
    %c0_1 = arith.constant 0 : index
    %c0_2 = arith.constant 0 : index
    %1 = vector.load %arg2[%c0_1, %c0_2] : memref<1x32xf32, #tpu.memory_space<vmem>>, vector<1x32xf32>
    %c0_3 = arith.constant 0 : index
    %c0_4 = arith.constant 0 : index
    %2 = vector.load %arg3[%c0_3, %c0_4] : memref<1x32xf32, #tpu.memory_space<vmem>>, vector<1x32xf32>
    %cst = arith.constant dense<0.000000e+00> : vector<32xf32>
    %3 = vector.multi_reduction <add>, %0, %cst [1] : vector<32x32xf32> to vector<32xf32>
    %4 = vector.shape_cast %3 : vector<32xf32> to vector<32x1xf32>
    %cst_5 = arith.constant 3.200000e+01 : f32
    %5 = vector.broadcast %cst_5 : f32 to vector<32x1xf32>
    %6 = arith.divf %4, %5 : vector<32x1xf32>
    %7 = vector.broadcast %6 : vector<32x1xf32> to vector<32x32xf32>
    %8 = arith.subf %0, %7 : vector<32x32xf32>
    %9 = arith.mulf %8, %8 : vector<32x32xf32>
    %cst_6 = arith.constant dense<0.000000e+00> : vector<32xf32>
    %10 = vector.multi_reduction <add>, %9, %cst_6 [1] : vector<32x32xf32> to vector<32xf32>
    %11 = vector.shape_cast %10 : vector<32xf32> to vector<32x1xf32>
    %cst_7 = arith.constant 3.200000e+01 : f32
    %12 = vector.broadcast %cst_7 : f32 to vector<32x1xf32>
    %13 = arith.divf %11, %12 : vector<32x1xf32>
    %cst_8 = arith.constant 9.99999974E-6 : f32
    %14 = vector.broadcast %cst_8 : f32 to vector<32x1xf32>
    %15 = arith.addf %13, %14 : vector<32x1xf32>
    %16 = math.rsqrt %15 : vector<32x1xf32>
    %17 = vector.broadcast %16 : vector<32x1xf32> to vector<32x32xf32>
    %18 = arith.mulf %8, %17 : vector<32x32xf32>
    %19 = vector.broadcast %1 : vector<1x32xf32> to vector<32x32xf32>
    %20 = arith.mulf %18, %19 : vector<32x32xf32>
    %21 = vector.broadcast %2 : vector<1x32xf32> to vector<32x32xf32>
    %22 = arith.addf %20, %21 : vector<32x32xf32>
    %23 = arith.truncf %22 : vector<32x32xf32> to vector<32x32xbf16>
    %c0_9 = arith.constant 0 : index
    %c0_10 = arith.constant 0 : index
    %24 = vector.load %arg4[%c0_9, %c0_10] : memref<32x96xbf16, #tpu.memory_space<vmem>>, vector<32x96xbf16>
    %cst_11 = arith.constant dense<0.000000e+00> : vector<32x96xf32>
    %25 = tpu.matmul %23, %24, %cst_11 {dimension_numbers = #tpu.dot_dimension_numbers<[1], [0], [0], [1], [0, 0, 1, 1], [], []>} : vector<32x32xbf16>, vector<32x96xbf16>, vector<32x96xf32> -> vector<32x96xf32>
    %c0_12 = arith.constant 0 : index
    %c0_13 = arith.constant 0 : index
    %26 = vector.load %arg5[%c0_12, %c0_13] : memref<1x96xf32, #tpu.memory_space<vmem>>, vector<1x96xf32>
    %27 = vector.broadcast %26 : vector<1x96xf32> to vector<32x96xf32>
    %28 = arith.addf %25, %27 : vector<32x96xf32>
    %29 = arith.truncf %28 : vector<32x96xf32> to vector<32x96xbf16>
    %c0_14 = arith.constant 0 : index
    %c0_15 = arith.constant 0 : index
    %30 = vector.load %arg6[%c0_14, %c0_15] : memref<32x96xbf16, #tpu.memory_space<vmem>>, vector<32x96xbf16>
    tpu.vector_store %arg6[%c0_14, %c0_15], %29 {strides = array<i32>} : memref<32x96xbf16, #tpu.memory_space<vmem>>, vector<32x96xbf16>,
    return
  }
  func.func @transform_0(%arg0: i32) -> (i32, i32) {
    %c0_i32 = arith.constant 0 : i32
    %c0_i32_0 = arith.constant 0 : i32
    return %arg0, %c0_i32 : i32, i32
  }
  func.func @transform_1(%arg0: i32) -> (i32, i32) {
    %c0_i32 = arith.constant 0 : i32
    %c0_i32_0 = arith.constant 0 : i32
    %c0_i32_1 = arith.constant 0 : i32
    return %c0_i32, %c0_i32_0 : i32, i32
  }
  func.func @transform_2(%arg0: i32) -> (i32, i32) {
    %c0_i32 = arith.constant 0 : i32
    %c0_i32_0 = arith.constant 0 : i32
    %c0_i32_1 = arith.constant 0 : i32
    return %c0_i32, %c0_i32_0 : i32, i32
  }
  func.func @transform_3(%arg0: i32) -> (i32, i32) {
    %c0_i32 = arith.constant 0 : i32
    %c0_i32_0 = arith.constant 0 : i32
    %c0_i32_1 = arith.constant 0 : i32
    return %c0_i32, %c0_i32_0 : i32, i32
  }
  func.func @transform_4(%arg0: i32) -> (i32, i32) {
    %c0_i32 = arith.constant 0 : i32
    %c0_i32_0 = arith.constant 0 : i32
    %c0_i32_1 = arith.constant 0 : i32
    return %c0_i32, %c0_i32_0 : i32, i32
  }
  func.func @transform_5(%arg0: i32) -> (i32, i32) {
    %c0_i32 = arith.constant 0 : i32
    %c0_i32_0 = arith.constant 0 : i32
    return %arg0, %c0_i32 : i32, i32
  }
}

module attributes {stable_mosaic.version = 11 : i64} {
  func.func @_spatial_attn_kernel(%arg0: i32, %arg1: i32, %arg2: memref<4xf32, #tpu.memory_space<smem>>, %arg3: memref<1x16x96xbf16, #tpu.memory_space<vmem>>, %arg4: memref<1x4x16xf32, #tpu.memory_space<vmem>>, %arg5: memref<1x16x16xbf16, #tpu.memory_space<vmem>>, %arg6: memref<1x16x16xi16, #tpu.memory_space<vmem>>, %arg7: memref<1x16x16xi16, #tpu.memory_space<vmem>>, %arg8: memref<1x16x32xbf16, #tpu.memory_space<vmem>>) attributes {dimension_semantics = [#tpu.dimension_semantics<parallel>, #tpu.dimension_semantics<arbitrary>], iteration_bounds = array<i64: 2, 1>, scalar_prefetch = 0 : i64, scratch_operands = 0 : i64, tpu.core_type = #tpu.core_type<tc>, window_params = [{transform_indices = @transform_0, window_bounds = array<i64: 4>}, {transform_indices = @transform_1, window_bounds = array<i64: 1, 16, 96>}, {transform_indices = @transform_2, window_bounds = array<i64: 1, 4, 16>}, {transform_indices = @transform_3, window_bounds = array<i64: 1, 16, 16>}, {transform_indices = @transform_4, window_bounds = array<i64: 1, 16, 16>}, {transform_indices = @transform_5, window_bounds = array<i64: 1, 16, 16>}, {transform_indices = @transform_6, window_bounds = array<i64: 1, 16, 32>}]} {
    %c16_i32 = arith.constant 16 : i32
    %0 = arith.muli %arg1, %c16_i32 : i32
    %1 = tpu.assume_multiple %0, 16 : i32
    %c0 = arith.constant 0 : index
    %c0_0 = arith.constant 0 : index
    %c0_1 = arith.constant 0 : index
    %2 = vector.load %arg5[%c0, %c0_0, %c0_1] : memref<1x16x16xbf16, #tpu.memory_space<vmem>>, vector<1x16x16xbf16>
    %3 = vector.shape_cast %2 : vector<1x16x16xbf16> to vector<16x16xbf16>
    %4 = arith.extf %3 : vector<16x16xbf16> to vector<16x16xf32>
    %c0_2 = arith.constant 0 : index
    %c0_3 = arith.constant 0 : index
    %c0_4 = arith.constant 0 : index
    %5 = vector.load %arg6[%c0_2, %c0_3, %c0_4] : memref<1x16x16xi16, #tpu.memory_space<vmem>>, vector<1x16x16xi16>
    %6 = vector.shape_cast %5 : vector<1x16x16xi16> to vector<16x16xi16>
    %7 = arith.extsi %6 : vector<16x16xi16> to vector<16x16xi32>
    %c0_5 = arith.constant 0 : index
    %c0_6 = arith.constant 0 : index
    %c0_7 = arith.constant 0 : index
    %8 = vector.load %arg7[%c0_5, %c0_6, %c0_7] : memref<1x16x16xi16, #tpu.memory_space<vmem>>, vector<1x16x16xi16>
    %9 = vector.shape_cast %8 : vector<1x16x16xi16> to vector<16x16xi16>
    %10 = arith.extsi %9 : vector<16x16xi16> to vector<16x16xi32>
    %c0_8 = arith.constant 0 : index
    %11 = memref.load %arg2[%c0_8] : memref<4xf32, #tpu.memory_space<smem>>
    %c0_9 = arith.constant 0 : index
    %12 = arith.index_cast %1 : i32 to index
    %c0_10 = arith.constant 0 : index
    %13 = vector.load %arg3[%c0_9, %12, %c0_10] : memref<1x16x96xbf16, #tpu.memory_space<vmem>>, vector<1x16x8xbf16>
    %14 = vector.shape_cast %13 : vector<1x16x8xbf16> to vector<16x8xbf16>
    %c0_11 = arith.constant 0 : index
    %c0_12 = arith.constant 0 : index
    %c32 = arith.constant 32 : index
    %15 = vector.load %arg3[%c0_11, %c0_12, %c32] : memref<1x16x96xbf16, #tpu.memory_space<vmem>>, vector<1x16x8xbf16>
    %16 = vector.shape_cast %15 : vector<1x16x8xbf16> to vector<16x8xbf16>
    %c0_13 = arith.constant 0 : index
    %c0_14 = arith.constant 0 : index
    %c64 = arith.constant 64 : index
    %17 = vector.load %arg3[%c0_13, %c0_14, %c64] : memref<1x16x96xbf16, #tpu.memory_space<vmem>>, vector<1x16x8xbf16>
    %18 = vector.shape_cast %17 : vector<1x16x8xbf16> to vector<16x8xbf16>
    %cst = arith.constant dense<0.000000e+00> : vector<16x16xf32>
    %19 = tpu.matmul %14, %16, %cst {dimension_numbers = #tpu.dot_dimension_numbers<[1], [1], [0], [0], [0, 0, 1, 0], [], []>} : vector<16x8xbf16>, vector<16x8xbf16>, vector<16x16xf32> -> vector<16x16xf32>
    %20 = arith.extf %14 : vector<16x8xbf16> to vector<16x8xf32>
    %21 = arith.mulf %20, %20 : vector<16x8xf32>
    %cst_15 = arith.constant dense<0.000000e+00> : vector<16xf32>
    %22 = vector.multi_reduction <add>, %21, %cst_15 [1] : vector<16x8xf32> to vector<16xf32>
    %23 = vector.shape_cast %22 : vector<16xf32> to vector<16x1xf32>
    %c0_16 = arith.constant 0 : index
    %c0_17 = arith.constant 0 : index
    %c0_18 = arith.constant 0 : index
    %24 = vector.load %arg4[%c0_16, %c0_17, %c0_18] : memref<1x4x16xf32, #tpu.memory_space<vmem>>, vector<1x1x16xf32>
    %25 = vector.shape_cast %24 : vector<1x1x16xf32> to vector<1x16xf32>
    %cst_19 = arith.constant 0.353553385 : f32
    %26 = vector.broadcast %cst_19 : f32 to vector<16x16xf32>
    %27 = arith.mulf %19, %26 : vector<16x16xf32>
    %cst_20 = arith.constant 0.176776692 : f32
    %28 = vector.broadcast %cst_20 : f32 to vector<16x1xf32>
    %29 = arith.mulf %28, %23 : vector<16x1xf32>
    %30 = vector.broadcast %29 : vector<16x1xf32> to vector<16x16xf32>
    %31 = arith.subf %27, %30 : vector<16x16xf32>
    %32 = vector.broadcast %25 : vector<1x16xf32> to vector<16x16xf32>
    %33 = arith.addf %31, %32 : vector<16x16xf32>
    %cst_21 = arith.constant 0.000000e+00 : f32
    %34 = arith.subf %cst_21, %11 : f32
    %35 = vector.broadcast %34 : f32 to vector<16x16xf32>
    %36 = arith.mulf %35, %4 : vector<16x16xf32>
    %37 = math.exp %36 : vector<16x16xf32>
    %cst_22 = arith.constant 9.99999997E-7 : f32
    %38 = vector.broadcast %cst_22 : f32 to vector<16x16xf32>
    %39 = arith.addf %37, %38 : vector<16x16xf32>
    %c3_i32 = arith.constant 3 : i32
    %40 = vector.broadcast %c3_i32 : i32 to vector<16x16xi32>
    %41 = arith.cmpi slt, %7, %40 : vector<16x16xi32>
    %42 = arith.extui %41 : vector<16x16xi1> to vector<16x16xi32>
    %43 = arith.sitofp %42 : vector<16x16xi32> to vector<16x16xf32>
    %c3_i32_23 = arith.constant 3 : i32
    %44 = vector.broadcast %c3_i32_23 : i32 to vector<16x16xi32>
    %45 = arith.cmpi slt, %10, %44 : vector<16x16xi32>
    %46 = arith.extui %45 : vector<16x16xi1> to vector<16x16xi32>
    %47 = arith.sitofp %46 : vector<16x16xi32> to vector<16x16xf32>
    %48 = arith.addf %43, %47 : vector<16x16xf32>
    %cst_24 = arith.constant dense<0xFF800000> : vector<16xf32>
    %49 = vector.multi_reduction <maximumf>, %33, %cst_24 [1] : vector<16x16xf32> to vector<16xf32>
    %50 = vector.shape_cast %49 : vector<16xf32> to vector<16x1xf32>
    %51 = vector.broadcast %50 : vector<16x1xf32> to vector<16x16xf32>
    %52 = arith.subf %33, %51 : vector<16x16xf32>
    %53 = math.exp %52 : vector<16x16xf32>
    %54 = arith.mulf %39, %48 : vector<16x16xf32>
    %55 = arith.mulf %53, %54 : vector<16x16xf32>
    %cst_25 = arith.constant dense<0.000000e+00> : vector<16xf32>
    %56 = vector.multi_reduction <add>, %55, %cst_25 [1] : vector<16x16xf32> to vector<16xf32>
    %57 = vector.shape_cast %56 : vector<16xf32> to vector<16x1xf32>
    %58 = arith.truncf %55 : vector<16x16xf32> to vector<16x16xbf16>
    %cst_26 = arith.constant dense<0.000000e+00> : vector<16x8xf32>
    %59 = tpu.matmul %58, %18, %cst_26 {dimension_numbers = #tpu.dot_dimension_numbers<[1], [0], [0], [1], [0, 0, 1, 1], [], []>} : vector<16x16xbf16>, vector<16x8xbf16>, vector<16x8xf32> -> vector<16x8xf32>
    %60 = tpu.reciprocal %57 : vector<16x1xf32> -> vector<16x1xf32>
    %61 = vector.broadcast %60 : vector<16x1xf32> to vector<16x8xf32>
    %62 = arith.mulf %59, %61 : vector<16x8xf32>
    %63 = arith.truncf %62 : vector<16x8xf32> to vector<16x8xbf16>
    %c0_27 = arith.constant 0 : index
    %c0_28 = arith.constant 0 : index
    %c0_29 = arith.constant 0 : index
    %64 = vector.load %arg8[%c0_27, %c0_28, %c0_29] : memref<1x16x32xbf16, #tpu.memory_space<vmem>>, vector<1x16x8xbf16>
    %65 = vector.shape_cast %64 : vector<1x16x8xbf16> to vector<16x8xbf16>
    %66 = vector.shape_cast %63 : vector<16x8xbf16> to vector<1x16x8xbf16>
    tpu.vector_store %arg8[%c0_27, %c0_28, %c0_29], %66 {strides = array<i32>} : memref<1x16x32xbf16, #tpu.memory_space<vmem>>, vector<1x16x8xbf16>,
    %c1 = arith.constant 1 : index
    %67 = memref.load %arg2[%c1] : memref<4xf32, #tpu.memory_space<smem>>
    %c0_30 = arith.constant 0 : index
    %68 = arith.index_cast %1 : i32 to index
    %c8 = arith.constant 8 : index
    %69 = vector.load %arg3[%c0_30, %68, %c8] : memref<1x16x96xbf16, #tpu.memory_space<vmem>>, vector<1x16x8xbf16>
    %70 = vector.shape_cast %69 : vector<1x16x8xbf16> to vector<16x8xbf16>
    %c0_31 = arith.constant 0 : index
    %c0_32 = arith.constant 0 : index
    %c40 = arith.constant 40 : index
    %71 = vector.load %arg3[%c0_31, %c0_32, %c40] : memref<1x16x96xbf16, #tpu.memory_space<vmem>>, vector<1x16x8xbf16>
    %72 = vector.shape_cast %71 : vector<1x16x8xbf16> to vector<16x8xbf16>
    %c0_33 = arith.constant 0 : index
    %c0_34 = arith.constant 0 : index
    %c72 = arith.constant 72 : index
    %73 = vector.load %arg3[%c0_33, %c0_34, %c72] : memref<1x16x96xbf16, #tpu.memory_space<vmem>>, vector<1x16x8xbf16>
    %74 = vector.shape_cast %73 : vector<1x16x8xbf16> to vector<16x8xbf16>
    %cst_35 = arith.constant dense<0.000000e+00> : vector<16x16xf32>
    %75 = tpu.matmul %70, %72, %cst_35 {dimension_numbers = #tpu.dot_dimension_numbers<[1], [1], [0], [0], [0, 0, 1, 0], [], []>} : vector<16x8xbf16>, vector<16x8xbf16>, vector<16x16xf32> -> vector<16x16xf32>
    %76 = arith.extf %70 : vector<16x8xbf16> to vector<16x8xf32>
    %77 = arith.mulf %76, %76 : vector<16x8xf32>
    %cst_36 = arith.constant dense<0.000000e+00> : vector<16xf32>
    %78 = vector.multi_reduction <add>, %77, %cst_36 [1] : vector<16x8xf32> to vector<16xf32>
    %79 = vector.shape_cast %78 : vector<16xf32> to vector<16x1xf32>
    %c0_37 = arith.constant 0 : index
    %c1_38 = arith.constant 1 : index
    %c0_39 = arith.constant 0 : index
    %80 = vector.load %arg4[%c0_37, %c1_38, %c0_39] : memref<1x4x16xf32, #tpu.memory_space<vmem>>, vector<1x1x16xf32>
    %81 = vector.shape_cast %80 : vector<1x1x16xf32> to vector<1x16xf32>
    %cst_40 = arith.constant 0.353553385 : f32
    %82 = vector.broadcast %cst_40 : f32 to vector<16x16xf32>
    %83 = arith.mulf %75, %82 : vector<16x16xf32>
    %cst_41 = arith.constant 0.176776692 : f32
    %84 = vector.broadcast %cst_41 : f32 to vector<16x1xf32>
    %85 = arith.mulf %84, %79 : vector<16x1xf32>
    %86 = vector.broadcast %85 : vector<16x1xf32> to vector<16x16xf32>
    %87 = arith.subf %83, %86 : vector<16x16xf32>
    %88 = vector.broadcast %81 : vector<1x16xf32> to vector<16x16xf32>
    %89 = arith.addf %87, %88 : vector<16x16xf32>
    %cst_42 = arith.constant 0.000000e+00 : f32
    %90 = arith.subf %cst_42, %67 : f32
    %91 = vector.broadcast %90 : f32 to vector<16x16xf32>
    %92 = arith.mulf %91, %4 : vector<16x16xf32>
    %93 = math.exp %92 : vector<16x16xf32>
    %cst_43 = arith.constant 9.99999997E-7 : f32
    %94 = vector.broadcast %cst_43 : f32 to vector<16x16xf32>
    %95 = arith.addf %93, %94 : vector<16x16xf32>
    %c5_i32 = arith.constant 5 : i32
    %96 = vector.broadcast %c5_i32 : i32 to vector<16x16xi32>
    %97 = arith.cmpi slt, %7, %96 : vector<16x16xi32>
    %98 = arith.extui %97 : vector<16x16xi1> to vector<16x16xi32>
    %99 = arith.sitofp %98 : vector<16x16xi32> to vector<16x16xf32>
    %c5_i32_44 = arith.constant 5 : i32
    %100 = vector.broadcast %c5_i32_44 : i32 to vector<16x16xi32>
    %101 = arith.cmpi slt, %10, %100 : vector<16x16xi32>
    %102 = arith.extui %101 : vector<16x16xi1> to vector<16x16xi32>
    %103 = arith.sitofp %102 : vector<16x16xi32> to vector<16x16xf32>
    %104 = arith.addf %99, %103 : vector<16x16xf32>
    %cst_45 = arith.constant dense<0xFF800000> : vector<16xf32>
    %105 = vector.multi_reduction <maximumf>, %89, %cst_45 [1] : vector<16x16xf32> to vector<16xf32>
    %106 = vector.shape_cast %105 : vector<16xf32> to vector<16x1xf32>
    %107 = vector.broadcast %106 : vector<16x1xf32> to vector<16x16xf32>
    %108 = arith.subf %89, %107 : vector<16x16xf32>
    %109 = math.exp %108 : vector<16x16xf32>
    %110 = arith.mulf %95, %104 : vector<16x16xf32>
    %111 = arith.mulf %109, %110 : vector<16x16xf32>
    %cst_46 = arith.constant dense<0.000000e+00> : vector<16xf32>
    %112 = vector.multi_reduction <add>, %111, %cst_46 [1] : vector<16x16xf32> to vector<16xf32>
    %113 = vector.shape_cast %112 : vector<16xf32> to vector<16x1xf32>
    %114 = arith.truncf %111 : vector<16x16xf32> to vector<16x16xbf16>
    %cst_47 = arith.constant dense<0.000000e+00> : vector<16x8xf32>
    %115 = tpu.matmul %114, %74, %cst_47 {dimension_numbers = #tpu.dot_dimension_numbers<[1], [0], [0], [1], [0, 0, 1, 1], [], []>} : vector<16x16xbf16>, vector<16x8xbf16>, vector<16x8xf32> -> vector<16x8xf32>
    %116 = tpu.reciprocal %113 : vector<16x1xf32> -> vector<16x1xf32>
    %117 = vector.broadcast %116 : vector<16x1xf32> to vector<16x8xf32>
    %118 = arith.mulf %115, %117 : vector<16x8xf32>
    %119 = arith.truncf %118 : vector<16x8xf32> to vector<16x8xbf16>
    %c0_48 = arith.constant 0 : index
    %c0_49 = arith.constant 0 : index
    %c8_50 = arith.constant 8 : index
    %120 = vector.load %arg8[%c0_48, %c0_49, %c8_50] : memref<1x16x32xbf16, #tpu.memory_space<vmem>>, vector<1x16x8xbf16>
    %121 = vector.shape_cast %120 : vector<1x16x8xbf16> to vector<16x8xbf16>
    %122 = vector.shape_cast %119 : vector<16x8xbf16> to vector<1x16x8xbf16>
    tpu.vector_store %arg8[%c0_48, %c0_49, %c8_50], %122 {strides = array<i32>} : memref<1x16x32xbf16, #tpu.memory_space<vmem>>, vector<1x16x8xbf16>,
    %c2 = arith.constant 2 : index
    %123 = memref.load %arg2[%c2] : memref<4xf32, #tpu.memory_space<smem>>
    %c0_51 = arith.constant 0 : index
    %124 = arith.index_cast %1 : i32 to index
    %c16 = arith.constant 16 : index
    %125 = vector.load %arg3[%c0_51, %124, %c16] : memref<1x16x96xbf16, #tpu.memory_space<vmem>>, vector<1x16x8xbf16>
    %126 = vector.shape_cast %125 : vector<1x16x8xbf16> to vector<16x8xbf16>
    %c0_52 = arith.constant 0 : index
    %c0_53 = arith.constant 0 : index
    %c48 = arith.constant 48 : index
    %127 = vector.load %arg3[%c0_52, %c0_53, %c48] : memref<1x16x96xbf16, #tpu.memory_space<vmem>>, vector<1x16x8xbf16>
    %128 = vector.shape_cast %127 : vector<1x16x8xbf16> to vector<16x8xbf16>
    %c0_54 = arith.constant 0 : index
    %c0_55 = arith.constant 0 : index
    %c80 = arith.constant 80 : index
    %129 = vector.load %arg3[%c0_54, %c0_55, %c80] : memref<1x16x96xbf16, #tpu.memory_space<vmem>>, vector<1x16x8xbf16>
    %130 = vector.shape_cast %129 : vector<1x16x8xbf16> to vector<16x8xbf16>
    %cst_56 = arith.constant dense<0.000000e+00> : vector<16x16xf32>
    %131 = tpu.matmul %126, %128, %cst_56 {dimension_numbers = #tpu.dot_dimension_numbers<[1], [1], [0], [0], [0, 0, 1, 0], [], []>} : vector<16x8xbf16>, vector<16x8xbf16>, vector<16x16xf32> -> vector<16x16xf32>
    %132 = arith.extf %126 : vector<16x8xbf16> to vector<16x8xf32>
    %133 = arith.mulf %132, %132 : vector<16x8xf32>
    %cst_57 = arith.constant dense<0.000000e+00> : vector<16xf32>
    %134 = vector.multi_reduction <add>, %133, %cst_57 [1] : vector<16x8xf32> to vector<16xf32>
    %135 = vector.shape_cast %134 : vector<16xf32> to vector<16x1xf32>
    %c0_58 = arith.constant 0 : index
    %c2_59 = arith.constant 2 : index
    %c0_60 = arith.constant 0 : index
    %136 = vector.load %arg4[%c0_58, %c2_59, %c0_60] : memref<1x4x16xf32, #tpu.memory_space<vmem>>, vector<1x1x16xf32>
    %137 = vector.shape_cast %136 : vector<1x1x16xf32> to vector<1x16xf32>
    %cst_61 = arith.constant 0.353553385 : f32
    %138 = vector.broadcast %cst_61 : f32 to vector<16x16xf32>
    %139 = arith.mulf %131, %138 : vector<16x16xf32>
    %cst_62 = arith.constant 0.176776692 : f32
    %140 = vector.broadcast %cst_62 : f32 to vector<16x1xf32>
    %141 = arith.mulf %140, %135 : vector<16x1xf32>
    %142 = vector.broadcast %141 : vector<16x1xf32> to vector<16x16xf32>
    %143 = arith.subf %139, %142 : vector<16x16xf32>
    %144 = vector.broadcast %137 : vector<1x16xf32> to vector<16x16xf32>
    %145 = arith.addf %143, %144 : vector<16x16xf32>
    %cst_63 = arith.constant 0.000000e+00 : f32
    %146 = arith.subf %cst_63, %123 : f32
    %147 = vector.broadcast %146 : f32 to vector<16x16xf32>
    %148 = arith.mulf %147, %4 : vector<16x16xf32>
    %149 = math.exp %148 : vector<16x16xf32>
    %cst_64 = arith.constant 9.99999997E-7 : f32
    %150 = vector.broadcast %cst_64 : f32 to vector<16x16xf32>
    %151 = arith.addf %149, %150 : vector<16x16xf32>
    %c8_i32 = arith.constant 8 : i32
    %152 = vector.broadcast %c8_i32 : i32 to vector<16x16xi32>
    %153 = arith.cmpi slt, %7, %152 : vector<16x16xi32>
    %154 = arith.extui %153 : vector<16x16xi1> to vector<16x16xi32>
    %155 = arith.sitofp %154 : vector<16x16xi32> to vector<16x16xf32>
    %c8_i32_65 = arith.constant 8 : i32
    %156 = vector.broadcast %c8_i32_65 : i32 to vector<16x16xi32>
    %157 = arith.cmpi slt, %10, %156 : vector<16x16xi32>
    %158 = arith.extui %157 : vector<16x16xi1> to vector<16x16xi32>
    %159 = arith.sitofp %158 : vector<16x16xi32> to vector<16x16xf32>
    %160 = arith.addf %155, %159 : vector<16x16xf32>
    %cst_66 = arith.constant dense<0xFF800000> : vector<16xf32>
    %161 = vector.multi_reduction <maximumf>, %145, %cst_66 [1] : vector<16x16xf32> to vector<16xf32>
    %162 = vector.shape_cast %161 : vector<16xf32> to vector<16x1xf32>
    %163 = vector.broadcast %162 : vector<16x1xf32> to vector<16x16xf32>
    %164 = arith.subf %145, %163 : vector<16x16xf32>
    %165 = math.exp %164 : vector<16x16xf32>
    %166 = arith.mulf %151, %160 : vector<16x16xf32>
    %167 = arith.mulf %165, %166 : vector<16x16xf32>
    %cst_67 = arith.constant dense<0.000000e+00> : vector<16xf32>
    %168 = vector.multi_reduction <add>, %167, %cst_67 [1] : vector<16x16xf32> to vector<16xf32>
    %169 = vector.shape_cast %168 : vector<16xf32> to vector<16x1xf32>
    %170 = arith.truncf %167 : vector<16x16xf32> to vector<16x16xbf16>
    %cst_68 = arith.constant dense<0.000000e+00> : vector<16x8xf32>
    %171 = tpu.matmul %170, %130, %cst_68 {dimension_numbers = #tpu.dot_dimension_numbers<[1], [0], [0], [1], [0, 0, 1, 1], [], []>} : vector<16x16xbf16>, vector<16x8xbf16>, vector<16x8xf32> -> vector<16x8xf32>
    %172 = tpu.reciprocal %169 : vector<16x1xf32> -> vector<16x1xf32>
    %173 = vector.broadcast %172 : vector<16x1xf32> to vector<16x8xf32>
    %174 = arith.mulf %171, %173 : vector<16x8xf32>
    %175 = arith.truncf %174 : vector<16x8xf32> to vector<16x8xbf16>
    %c0_69 = arith.constant 0 : index
    %c0_70 = arith.constant 0 : index
    %c16_71 = arith.constant 16 : index
    %176 = vector.load %arg8[%c0_69, %c0_70, %c16_71] : memref<1x16x32xbf16, #tpu.memory_space<vmem>>, vector<1x16x8xbf16>
    %177 = vector.shape_cast %176 : vector<1x16x8xbf16> to vector<16x8xbf16>
    %178 = vector.shape_cast %175 : vector<16x8xbf16> to vector<1x16x8xbf16>
    tpu.vector_store %arg8[%c0_69, %c0_70, %c16_71], %178 {strides = array<i32>} : memref<1x16x32xbf16, #tpu.memory_space<vmem>>, vector<1x16x8xbf16>,
    %c3 = arith.constant 3 : index
    %179 = memref.load %arg2[%c3] : memref<4xf32, #tpu.memory_space<smem>>
    %c0_72 = arith.constant 0 : index
    %180 = arith.index_cast %1 : i32 to index
    %c24 = arith.constant 24 : index
    %181 = vector.load %arg3[%c0_72, %180, %c24] : memref<1x16x96xbf16, #tpu.memory_space<vmem>>, vector<1x16x8xbf16>
    %182 = vector.shape_cast %181 : vector<1x16x8xbf16> to vector<16x8xbf16>
    %c0_73 = arith.constant 0 : index
    %c0_74 = arith.constant 0 : index
    %c56 = arith.constant 56 : index
    %183 = vector.load %arg3[%c0_73, %c0_74, %c56] : memref<1x16x96xbf16, #tpu.memory_space<vmem>>, vector<1x16x8xbf16>
    %184 = vector.shape_cast %183 : vector<1x16x8xbf16> to vector<16x8xbf16>
    %c0_75 = arith.constant 0 : index
    %c0_76 = arith.constant 0 : index
    %c88 = arith.constant 88 : index
    %185 = vector.load %arg3[%c0_75, %c0_76, %c88] : memref<1x16x96xbf16, #tpu.memory_space<vmem>>, vector<1x16x8xbf16>
    %186 = vector.shape_cast %185 : vector<1x16x8xbf16> to vector<16x8xbf16>
    %cst_77 = arith.constant dense<0.000000e+00> : vector<16x16xf32>
    %187 = tpu.matmul %182, %184, %cst_77 {dimension_numbers = #tpu.dot_dimension_numbers<[1], [1], [0], [0], [0, 0, 1, 0], [], []>} : vector<16x8xbf16>, vector<16x8xbf16>, vector<16x16xf32> -> vector<16x16xf32>
    %188 = arith.extf %182 : vector<16x8xbf16> to vector<16x8xf32>
    %189 = arith.mulf %188, %188 : vector<16x8xf32>
    %cst_78 = arith.constant dense<0.000000e+00> : vector<16xf32>
    %190 = vector.multi_reduction <add>, %189, %cst_78 [1] : vector<16x8xf32> to vector<16xf32>
    %191 = vector.shape_cast %190 : vector<16xf32> to vector<16x1xf32>
    %c0_79 = arith.constant 0 : index
    %c3_80 = arith.constant 3 : index
    %c0_81 = arith.constant 0 : index
    %192 = vector.load %arg4[%c0_79, %c3_80, %c0_81] : memref<1x4x16xf32, #tpu.memory_space<vmem>>, vector<1x1x16xf32>
    %193 = vector.shape_cast %192 : vector<1x1x16xf32> to vector<1x16xf32>
    %cst_82 = arith.constant 0.353553385 : f32
    %194 = vector.broadcast %cst_82 : f32 to vector<16x16xf32>
    %195 = arith.mulf %187, %194 : vector<16x16xf32>
    %cst_83 = arith.constant 0.176776692 : f32
    %196 = vector.broadcast %cst_83 : f32 to vector<16x1xf32>
    %197 = arith.mulf %196, %191 : vector<16x1xf32>
    %198 = vector.broadcast %197 : vector<16x1xf32> to vector<16x16xf32>
    %199 = arith.subf %195, %198 : vector<16x16xf32>
    %200 = vector.broadcast %193 : vector<1x16xf32> to vector<16x16xf32>
    %201 = arith.addf %199, %200 : vector<16x16xf32>
    %cst_84 = arith.constant 0.000000e+00 : f32
    %202 = arith.subf %cst_84, %179 : f32
    %203 = vector.broadcast %202 : f32 to vector<16x16xf32>
    %204 = arith.mulf %203, %4 : vector<16x16xf32>
    %205 = math.exp %204 : vector<16x16xf32>
    %cst_85 = arith.constant 9.99999997E-7 : f32
    %206 = vector.broadcast %cst_85 : f32 to vector<16x16xf32>
    %207 = arith.addf %205, %206 : vector<16x16xf32>
    %c11_i32 = arith.constant 11 : i32
    %208 = vector.broadcast %c11_i32 : i32 to vector<16x16xi32>
    %209 = arith.cmpi slt, %7, %208 : vector<16x16xi32>
    %210 = arith.extui %209 : vector<16x16xi1> to vector<16x16xi32>
    %211 = arith.sitofp %210 : vector<16x16xi32> to vector<16x16xf32>
    %c11_i32_86 = arith.constant 11 : i32
    %212 = vector.broadcast %c11_i32_86 : i32 to vector<16x16xi32>
    %213 = arith.cmpi slt, %10, %212 : vector<16x16xi32>
    %214 = arith.extui %213 : vector<16x16xi1> to vector<16x16xi32>
    %215 = arith.sitofp %214 : vector<16x16xi32> to vector<16x16xf32>
    %216 = arith.addf %211, %215 : vector<16x16xf32>
    %cst_87 = arith.constant dense<0xFF800000> : vector<16xf32>
    %217 = vector.multi_reduction <maximumf>, %201, %cst_87 [1] : vector<16x16xf32> to vector<16xf32>
    %218 = vector.shape_cast %217 : vector<16xf32> to vector<16x1xf32>
    %219 = vector.broadcast %218 : vector<16x1xf32> to vector<16x16xf32>
    %220 = arith.subf %201, %219 : vector<16x16xf32>
    %221 = math.exp %220 : vector<16x16xf32>
    %222 = arith.mulf %207, %216 : vector<16x16xf32>
    %223 = arith.mulf %221, %222 : vector<16x16xf32>
    %cst_88 = arith.constant dense<0.000000e+00> : vector<16xf32>
    %224 = vector.multi_reduction <add>, %223, %cst_88 [1] : vector<16x16xf32> to vector<16xf32>
    %225 = vector.shape_cast %224 : vector<16xf32> to vector<16x1xf32>
    %226 = arith.truncf %223 : vector<16x16xf32> to vector<16x16xbf16>
    %cst_89 = arith.constant dense<0.000000e+00> : vector<16x8xf32>
    %227 = tpu.matmul %226, %186, %cst_89 {dimension_numbers = #tpu.dot_dimension_numbers<[1], [0], [0], [1], [0, 0, 1, 1], [], []>} : vector<16x16xbf16>, vector<16x8xbf16>, vector<16x8xf32> -> vector<16x8xf32>
    %228 = tpu.reciprocal %225 : vector<16x1xf32> -> vector<16x1xf32>
    %229 = vector.broadcast %228 : vector<16x1xf32> to vector<16x8xf32>
    %230 = arith.mulf %227, %229 : vector<16x8xf32>
    %231 = arith.truncf %230 : vector<16x8xf32> to vector<16x8xbf16>
    %c0_90 = arith.constant 0 : index
    %c0_91 = arith.constant 0 : index
    %c24_92 = arith.constant 24 : index
    %232 = vector.load %arg8[%c0_90, %c0_91, %c24_92] : memref<1x16x32xbf16, #tpu.memory_space<vmem>>, vector<1x16x8xbf16>
    %233 = vector.shape_cast %232 : vector<1x16x8xbf16> to vector<16x8xbf16>
    %234 = vector.shape_cast %231 : vector<16x8xbf16> to vector<1x16x8xbf16>
    tpu.vector_store %arg8[%c0_90, %c0_91, %c24_92], %234 {strides = array<i32>} : memref<1x16x32xbf16, #tpu.memory_space<vmem>>, vector<1x16x8xbf16>,
    return
  }
  func.func @transform_0(%arg0: i32, %arg1: i32) -> i32 {
    %c0_i32 = arith.constant 0 : i32
    %c0_i32_0 = arith.constant 0 : i32
    return %c0_i32 : i32
  }
  func.func @transform_1(%arg0: i32, %arg1: i32) -> (i32, i32, i32) {
    %c0_i32 = arith.constant 0 : i32
    %c0_i32_0 = arith.constant 0 : i32
    %c0_i32_1 = arith.constant 0 : i32
    return %arg0, %c0_i32, %c0_i32_0 : i32, i32, i32
  }
  func.func @transform_2(%arg0: i32, %arg1: i32) -> (i32, i32, i32) {
    %c0_i32 = arith.constant 0 : i32
    %c0_i32_0 = arith.constant 0 : i32
    %c0_i32_1 = arith.constant 0 : i32
    return %arg0, %c0_i32, %c0_i32_0 : i32, i32, i32
  }
  func.func @transform_3(%arg0: i32, %arg1: i32) -> (i32, i32, i32) {
    %c0_i32 = arith.constant 0 : i32
    %c0_i32_0 = arith.constant 0 : i32
    return %arg0, %arg1, %c0_i32 : i32, i32, i32
  }
  func.func @transform_4(%arg0: i32, %arg1: i32) -> (i32, i32, i32) {
    %c0_i32 = arith.constant 0 : i32
    %c0_i32_0 = arith.constant 0 : i32
    return %arg0, %arg1, %c0_i32 : i32, i32, i32
  }
  func.func @transform_5(%arg0: i32, %arg1: i32) -> (i32, i32, i32) {
    %c0_i32 = arith.constant 0 : i32
    %c0_i32_0 = arith.constant 0 : i32
    return %arg0, %arg1, %c0_i32 : i32, i32, i32
  }
  func.func @transform_6(%arg0: i32, %arg1: i32) -> (i32, i32, i32) {
    %c0_i32 = arith.constant 0 : i32
    %c0_i32_0 = arith.constant 0 : i32
    return %arg0, %arg1, %c0_i32 : i32, i32, i32
  }
}

module attributes {stable_mosaic.version = 11 : i64} {
  func.func @_proj_mlp_kernel(%arg0: i32, %arg1: memref<32x32xbf16, #tpu.memory_space<vmem>>, %arg2: memref<32x32xf32, #tpu.memory_space<vmem>>, %arg3: memref<32x32xbf16, #tpu.memory_space<vmem>>, %arg4: memref<1x32xf32, #tpu.memory_space<vmem>>, %arg5: memref<1x32xf32, #tpu.memory_space<vmem>>, %arg6: memref<1x32xf32, #tpu.memory_space<vmem>>, %arg7: memref<32x128xbf16, #tpu.memory_space<vmem>>, %arg8: memref<1x128xf32, #tpu.memory_space<vmem>>, %arg9: memref<128x32xbf16, #tpu.memory_space<vmem>>, %arg10: memref<1x32xf32, #tpu.memory_space<vmem>>, %arg11: memref<32x32xf32, #tpu.memory_space<vmem>>) attributes {dimension_semantics = [#tpu.dimension_semantics<parallel>], iteration_bounds = array<i64: 1>, scalar_prefetch = 0 : i64, scratch_operands = 0 : i64, tpu.core_type = #tpu.core_type<tc>, window_params = [{transform_indices = @transform_0, window_bounds = array<i64: 32, 32>}, {transform_indices = @transform_1, window_bounds = array<i64: 32, 32>}, {pipeline_mode = #tpu.pipeline_mode<synchronous>, transform_indices = @transform_2, window_bounds = array<i64: 32, 32>}, {pipeline_mode = #tpu.pipeline_mode<synchronous>, transform_indices = @transform_3, window_bounds = array<i64: 1, 32>}, {pipeline_mode = #tpu.pipeline_mode<synchronous>, transform_indices = @transform_4, window_bounds = array<i64: 1, 32>}, {pipeline_mode = #tpu.pipeline_mode<synchronous>, transform_indices = @transform_5, window_bounds = array<i64: 1, 32>}, {pipeline_mode = #tpu.pipeline_mode<synchronous>, transform_indices = @transform_6, window_bounds = array<i64: 32, 128>}, {pipeline_mode = #tpu.pipeline_mode<synchronous>, transform_indices = @transform_7, window_bounds = array<i64: 1, 128>}, {pipeline_mode = #tpu.pipeline_mode<synchronous>, transform_indices = @transform_8, window_bounds = array<i64: 128, 32>}, {pipeline_mode = #tpu.pipeline_mode<synchronous>, transform_indices = @transform_9, window_bounds = array<i64: 1, 32>}, {transform_indices = @transform_10, window_bounds = array<i64: 32, 32>}]} {
    %c0 = arith.constant 0 : index
    %c0_0 = arith.constant 0 : index
    %0 = vector.load %arg2[%c0, %c0_0] : memref<32x32xf32, #tpu.memory_space<vmem>>, vector<32x32xf32>
    %c0_1 = arith.constant 0 : index
    %c0_2 = arith.constant 0 : index
    %1 = vector.load %arg1[%c0_1, %c0_2] : memref<32x32xbf16, #tpu.memory_space<vmem>>, vector<32x32xbf16>
    %c0_3 = arith.constant 0 : index
    %c0_4 = arith.constant 0 : index
    %2 = vector.load %arg3[%c0_3, %c0_4] : memref<32x32xbf16, #tpu.memory_space<vmem>>, vector<32x32xbf16>
    %cst = arith.constant dense<0.000000e+00> : vector<32x32xf32>
    %3 = tpu.matmul %1, %2, %cst {dimension_numbers = #tpu.dot_dimension_numbers<[1], [0], [0], [1], [0, 0, 1, 1], [], []>} : vector<32x32xbf16>, vector<32x32xbf16>, vector<32x32xf32> -> vector<32x32xf32>
    %4 = arith.addf %0, %3 : vector<32x32xf32>
    %c0_5 = arith.constant 0 : index
    %c0_6 = arith.constant 0 : index
    %5 = vector.load %arg4[%c0_5, %c0_6] : memref<1x32xf32, #tpu.memory_space<vmem>>, vector<1x32xf32>
    %6 = vector.broadcast %5 : vector<1x32xf32> to vector<32x32xf32>
    %7 = arith.addf %4, %6 : vector<32x32xf32>
    %c0_7 = arith.constant 0 : index
    %c0_8 = arith.constant 0 : index
    %8 = vector.load %arg5[%c0_7, %c0_8] : memref<1x32xf32, #tpu.memory_space<vmem>>, vector<1x32xf32>
    %c0_9 = arith.constant 0 : index
    %c0_10 = arith.constant 0 : index
    %9 = vector.load %arg6[%c0_9, %c0_10] : memref<1x32xf32, #tpu.memory_space<vmem>>, vector<1x32xf32>
    %cst_11 = arith.constant dense<0.000000e+00> : vector<32xf32>
    %10 = vector.multi_reduction <add>, %7, %cst_11 [1] : vector<32x32xf32> to vector<32xf32>
    %11 = vector.shape_cast %10 : vector<32xf32> to vector<32x1xf32>
    %cst_12 = arith.constant 3.200000e+01 : f32
    %12 = vector.broadcast %cst_12 : f32 to vector<32x1xf32>
    %13 = arith.divf %11, %12 : vector<32x1xf32>
    %14 = vector.broadcast %13 : vector<32x1xf32> to vector<32x32xf32>
    %15 = arith.subf %7, %14 : vector<32x32xf32>
    %16 = arith.mulf %15, %15 : vector<32x32xf32>
    %cst_13 = arith.constant dense<0.000000e+00> : vector<32xf32>
    %17 = vector.multi_reduction <add>, %16, %cst_13 [1] : vector<32x32xf32> to vector<32xf32>
    %18 = vector.shape_cast %17 : vector<32xf32> to vector<32x1xf32>
    %cst_14 = arith.constant 3.200000e+01 : f32
    %19 = vector.broadcast %cst_14 : f32 to vector<32x1xf32>
    %20 = arith.divf %18, %19 : vector<32x1xf32>
    %cst_15 = arith.constant 9.99999974E-6 : f32
    %21 = vector.broadcast %cst_15 : f32 to vector<32x1xf32>
    %22 = arith.addf %20, %21 : vector<32x1xf32>
    %23 = math.rsqrt %22 : vector<32x1xf32>
    %24 = vector.broadcast %23 : vector<32x1xf32> to vector<32x32xf32>
    %25 = arith.mulf %15, %24 : vector<32x32xf32>
    %26 = vector.broadcast %8 : vector<1x32xf32> to vector<32x32xf32>
    %27 = arith.mulf %25, %26 : vector<32x32xf32>
    %28 = vector.broadcast %9 : vector<1x32xf32> to vector<32x32xf32>
    %29 = arith.addf %27, %28 : vector<32x32xf32>
    %30 = arith.truncf %29 : vector<32x32xf32> to vector<32x32xbf16>
    %c0_16 = arith.constant 0 : index
    %c0_17 = arith.constant 0 : index
    %31 = vector.load %arg7[%c0_16, %c0_17] : memref<32x128xbf16, #tpu.memory_space<vmem>>, vector<32x128xbf16>
    %cst_18 = arith.constant dense<0.000000e+00> : vector<32x128xf32>
    %32 = tpu.matmul %30, %31, %cst_18 {dimension_numbers = #tpu.dot_dimension_numbers<[1], [0], [0], [1], [0, 0, 1, 1], [], []>} : vector<32x32xbf16>, vector<32x128xbf16>, vector<32x128xf32> -> vector<32x128xf32>
    %c0_19 = arith.constant 0 : index
    %c0_20 = arith.constant 0 : index
    %33 = vector.load %arg8[%c0_19, %c0_20] : memref<1x128xf32, #tpu.memory_space<vmem>>, vector<1x128xf32>
    %34 = vector.broadcast %33 : vector<1x128xf32> to vector<32x128xf32>
    %35 = arith.addf %32, %34 : vector<32x128xf32>
    %cst_21 = arith.constant 5.000000e-01 : f32
    %36 = vector.broadcast %cst_21 : f32 to vector<32x128xf32>
    %37 = arith.mulf %36, %35 : vector<32x128xf32>
    %cst_22 = arith.constant 0.707106769 : f32
    %38 = vector.broadcast %cst_22 : f32 to vector<32x128xf32>
    %39 = arith.mulf %35, %38 : vector<32x128xf32>
    %cst_23 = arith.constant 0.000000e+00 : f32
    %40 = vector.broadcast %cst_23 : f32 to vector<32x128xf32>
    %41 = arith.cmpf oge, %39, %40 : vector<32x128xf32>
    %cst_24 = arith.constant 1.000000e+00 : f32
    %cst_25 = arith.constant -1.000000e+00 : f32
    %42 = vector.broadcast %cst_24 : f32 to vector<32x128xf32>
    %43 = vector.broadcast %cst_25 : f32 to vector<32x128xf32>
    %44 = arith.select %41, %42, %43 : vector<32x128xi1>, vector<32x128xf32>
    %45 = math.absf %39 : vector<32x128xf32>
    %cst_26 = arith.constant 0.327591091 : f32
    %46 = vector.broadcast %cst_26 : f32 to vector<32x128xf32>
    %47 = arith.mulf %46, %45 : vector<32x128xf32>
    %cst_27 = arith.constant 1.000000e+00 : f32
    %48 = vector.broadcast %cst_27 : f32 to vector<32x128xf32>
    %49 = arith.addf %48, %47 : vector<32x128xf32>
    %cst_28 = arith.constant 1.000000e+00 : f32
    %50 = vector.broadcast %cst_28 : f32 to vector<32x128xf32>
    %51 = arith.divf %50, %49 : vector<32x128xf32>
    %cst_29 = arith.constant 1.06140542 : f32
    %52 = vector.broadcast %cst_29 : f32 to vector<32x128xf32>
    %53 = arith.mulf %52, %51 : vector<32x128xf32>
    %cst_30 = arith.constant -1.45315206 : f32
    %54 = vector.broadcast %cst_30 : f32 to vector<32x128xf32>
    %55 = arith.addf %53, %54 : vector<32x128xf32>
    %56 = arith.mulf %55, %51 : vector<32x128xf32>
    %cst_31 = arith.constant 1.42141378 : f32
    %57 = vector.broadcast %cst_31 : f32 to vector<32x128xf32>
    %58 = arith.addf %56, %57 : vector<32x128xf32>
    %59 = arith.mulf %58, %51 : vector<32x128xf32>
    %cst_32 = arith.constant -0.284496725 : f32
    %60 = vector.broadcast %cst_32 : f32 to vector<32x128xf32>
    %61 = arith.addf %59, %60 : vector<32x128xf32>
    %62 = arith.mulf %61, %51 : vector<32x128xf32>
    %cst_33 = arith.constant 0.254829586 : f32
    %63 = vector.broadcast %cst_33 : f32 to vector<32x128xf32>
    %64 = arith.addf %62, %63 : vector<32x128xf32>
    %65 = arith.mulf %64, %51 : vector<32x128xf32>
    %cst_34 = arith.constant 0.000000e+00 : f32
    %66 = vector.broadcast %cst_34 : f32 to vector<32x128xf32>
    %67 = arith.subf %66, %45 : vector<32x128xf32>
    %68 = arith.mulf %67, %45 : vector<32x128xf32>
    %69 = math.exp %68 : vector<32x128xf32>
    %70 = arith.mulf %65, %69 : vector<32x128xf32>
    %cst_35 = arith.constant 1.000000e+00 : f32
    %71 = vector.broadcast %cst_35 : f32 to vector<32x128xf32>
    %72 = arith.subf %71, %70 : vector<32x128xf32>
    %73 = arith.mulf %44, %72 : vector<32x128xf32>
    %cst_36 = arith.constant 1.000000e+00 : f32
    %74 = vector.broadcast %cst_36 : f32 to vector<32x128xf32>
    %75 = arith.addf %74, %73 : vector<32x128xf32>
    %76 = arith.mulf %37, %75 : vector<32x128xf32>
    %77 = arith.truncf %76 : vector<32x128xf32> to vector<32x128xbf16>
    %c0_37 = arith.constant 0 : index
    %c0_38 = arith.constant 0 : index
    %78 = vector.load %arg9[%c0_37, %c0_38] : memref<128x32xbf16, #tpu.memory_space<vmem>>, vector<128x32xbf16>
    %cst_39 = arith.constant dense<0.000000e+00> : vector<32x32xf32>
    %79 = tpu.matmul %77, %78, %cst_39 {dimension_numbers = #tpu.dot_dimension_numbers<[1], [0], [0], [1], [0, 0, 1, 1], [], []>} : vector<32x128xbf16>, vector<128x32xbf16>, vector<32x32xf32> -> vector<32x32xf32>
    %80 = arith.addf %7, %79 : vector<32x32xf32>
    %c0_40 = arith.constant 0 : index
    %c0_41 = arith.constant 0 : index
    %81 = vector.load %arg10[%c0_40, %c0_41] : memref<1x32xf32, #tpu.memory_space<vmem>>, vector<1x32xf32>
    %82 = vector.broadcast %81 : vector<1x32xf32> to vector<32x32xf32>
    %83 = arith.addf %80, %82 : vector<32x32xf32>
    %c0_42 = arith.constant 0 : index
    %c0_43 = arith.constant 0 : index
    %84 = vector.load %arg11[%c0_42, %c0_43] : memref<32x32xf32, #tpu.memory_space<vmem>>, vector<32x32xf32>
    tpu.vector_store %arg11[%c0_42, %c0_43], %83 {strides = array<i32>} : memref<32x32xf32, #tpu.memory_space<vmem>>, vector<32x32xf32>,
    return
  }
  func.func @transform_0(%arg0: i32) -> (i32, i32) {
    %c0_i32 = arith.constant 0 : i32
    %c0_i32_0 = arith.constant 0 : i32
    return %arg0, %c0_i32 : i32, i32
  }
  func.func @transform_1(%arg0: i32) -> (i32, i32) {
    %c0_i32 = arith.constant 0 : i32
    %c0_i32_0 = arith.constant 0 : i32
    return %arg0, %c0_i32 : i32, i32
  }
  func.func @transform_2(%arg0: i32) -> (i32, i32) {
    %c0_i32 = arith.constant 0 : i32
    %c0_i32_0 = arith.constant 0 : i32
    %c0_i32_1 = arith.constant 0 : i32
    return %c0_i32, %c0_i32_0 : i32, i32
  }
  func.func @transform_3(%arg0: i32) -> (i32, i32) {
    %c0_i32 = arith.constant 0 : i32
    %c0_i32_0 = arith.constant 0 : i32
    %c0_i32_1 = arith.constant 0 : i32
    return %c0_i32, %c0_i32_0 : i32, i32
  }
  func.func @transform_4(%arg0: i32) -> (i32, i32) {
    %c0_i32 = arith.constant 0 : i32
    %c0_i32_0 = arith.constant 0 : i32
    %c0_i32_1 = arith.constant 0 : i32
    return %c0_i32, %c0_i32_0 : i32, i32
  }
  func.func @transform_5(%arg0: i32) -> (i32, i32) {
    %c0_i32 = arith.constant 0 : i32
    %c0_i32_0 = arith.constant 0 : i32
    %c0_i32_1 = arith.constant 0 : i32
    return %c0_i32, %c0_i32_0 : i32, i32
  }
  func.func @transform_6(%arg0: i32) -> (i32, i32) {
    %c0_i32 = arith.constant 0 : i32
    %c0_i32_0 = arith.constant 0 : i32
    %c0_i32_1 = arith.constant 0 : i32
    return %c0_i32, %c0_i32_0 : i32, i32
  }
  func.func @transform_7(%arg0: i32) -> (i32, i32) {
    %c0_i32 = arith.constant 0 : i32
    %c0_i32_0 = arith.constant 0 : i32
    %c0_i32_1 = arith.constant 0 : i32
    return %c0_i32, %c0_i32_0 : i32, i32
  }
  func.func @transform_8(%arg0: i32) -> (i32, i32) {
    %c0_i32 = arith.constant 0 : i32
    %c0_i32_0 = arith.constant 0 : i32
    %c0_i32_1 = arith.constant 0 : i32
    return %c0_i32, %c0_i32_0 : i32, i32
  }
  func.func @transform_9(%arg0: i32) -> (i32, i32) {
    %c0_i32 = arith.constant 0 : i32
    %c0_i32_0 = arith.constant 0 : i32
    %c0_i32_1 = arith.constant 0 : i32
    return %c0_i32, %c0_i32_0 : i32, i32
  }
  func.func @transform_10(%arg0: i32) -> (i32, i32) {
    %c0_i32 = arith.constant 0 : i32
    %c0_i32_0 = arith.constant 0 : i32
    return %arg0, %c0_i32 : i32, i32
  }
}

</mosaic_0001>

<bundles_post_ra>
// kernel: spatial_block_forward.3
= control target key start
LH: loop header
LB: loop body
LE: loop exit
PB: predicated region body
PF: predicated region fallthrough
CT: control target
= control target key end

     0   :  { %vm27_vm0 = vcmask 261120   ;;  %vm197_vm1 = vcmask 781312   ;;  %s322_s0 = inlined_call_operand.vmem [shape: f32[32,32], index: 0, kind: input, shape index: {}]   ;;  %s323_s3 = inlined_call_operand.vmem [shape: bf16[32,96], index: 3, kind: input, shape index: {}]   ;;  %s324_s1 = inlined_call_operand.vmem [shape: f32[1,32], index: 1, kind: input, shape index: {}]   ;;  %s325_s2 = inlined_call_operand.vmem [shape: f32[1,32], index: 2, kind: input, shape index: {}]   ;;  %s326_s4 = inlined_call_operand.vmem [shape: f32[1,96], index: 4, kind: input, shape index: {}]   ;;  %s327_s5 = inlined_call_operand.vmem [shape: bf16[32,96], index: 5, kind: output, shape index: {}]  }
   0x1   :  { %v21_v0 = vld [vmem:[%s322_s0] sm:$0xff]  ;;  %v23_v1 = vld [vmem:[%s322_s0 + $0x10] sm:$0xff]  ;;  %v22_v2 = vld [vmem:[%s322_s0 + $0x8] sm:$0xff] }
   0x2   :  { %v28_v3 = vsel %vm27_vm0, %v21_v0, 0.0  ;;  %v34_v4 = vsel %vm27_vm0, %v23_v1, 0.0  ;;  %v24_v5 = vld [vmem:[%s322_s0 + $0x18] sm:$0xff]  ;;  %v31_v6 = vsel %vm27_vm0, %v22_v2, 0.0  ;;  %v233_v28 = vld [vmem:[%s323_s3 + $0x8] sm:$0xff]   ;;  %v234_v29 = vld [vmem:[%s323_s3] sm:$0xff]  }
   0x3   :  { %29 = vadd.xlane.f32.xlu0 %v28_v3  ;;  %35 = vadd.xlane.f32.xlu1 %v34_v4  ;;  %v37_v7 = vsel %vm27_vm0, %v24_v5, 0.0  ;;  %v206_v44 = vld [vmem:[%s324_s1] ss:$0 sm:$0xff] }
   0x4   :  { %225 = vmatprep.subr.bf16.mxu0 %v233_v28  ;;  %v207_v49 = vld [vmem:[%s325_s2] ss:$0 sm:$0xff] }
   0x5   :  { %226 = vmatpush3.bf16.msra.mxu0 %v233_v28  ;;  %v208_v62 = vld [vmem:[%s326_s4] ss:$0 sm:$0xff] }
   0x6   :  { %227 = vmatprep.subr.bf16.mxu0 %v234_v29 }
   0x7   :  { %32 = vadd.xlane.f32.xlu0 %v31_v6  ;;  %38 = vadd.xlane.f32.xlu1 %v37_v7 }
   0x9   :  { %228 = vmatpush3.bf16.msra.mxu0 %v234_v29 }
  0x8c   :  { %v30_v8 = vpop.xlane.xlu0 %29  ;;  %v36_v9 = vpop.xlane.xlu1 %35 }
  0x8d   :  { %v41_v10 = vmul.f32 0.03125, %v30_v8  ;;  %v43_v11 = vmul.f32 0.03125, %v36_v9 }
  0x8f   :  { %v45_v12 = vsub.f32 %v21_v0, %v41_v10  ;;  %v47_v13 = vsub.f32 %v23_v1, %v43_v11 }
  0x90   :  { %v33_v14 = vpop.xlane.xlu0 %32  ;;  %v39_v15 = vpop.xlane.xlu1 %38 }
  0x91   :  { %v42_v16 = vmul.f32 0.03125, %v33_v14  ;;  %v44_v17 = vmul.f32 0.03125, %v39_v15  ;;  %v49_v18 = vmul.f32 %v45_v12, %v45_v12  ;;  %v51_v19 = vmul.f32 %v47_v13, %v47_v13 }
  0x93   :  { %v46_v20 = vsub.f32 %v22_v2, %v42_v16  ;;  %v48_v21 = vsub.f32 %v24_v5, %v44_v17  ;;  %v53_v22 = vsel %vm27_vm0, %v49_v18, 0.0  ;;  %v59_v23 = vsel %vm27_vm0, %v51_v19, 0.0 }
  0x94   :  { %54 = vadd.xlane.f32.xlu0 %v53_v22 }
  0x95   :  { %v50_v24 = vmul.f32 %v46_v20, %v46_v20  ;;  %v52_v25 = vmul.f32 %v48_v21, %v48_v21 }
  0x97   :  { %v56_v26 = vsel %vm27_vm0, %v50_v24, 0.0  ;;  %v62_v27 = vsel %vm27_vm0, %v52_v25, 0.0 }
  0x98   :  { %60 = vadd.xlane.f32.xlu0 %v59_v23  ;;  %57 = vadd.xlane.f32.xlu1 %v56_v26 }
  0x9c   :  { %63 = vadd.xlane.f32.xlu1 %v62_v27 }
 0x11d   :  { %v55_v30 = vpop.xlane.xlu0 %54 }
 0x11e   :  { %v65_v31 = vmul.f32 0.03125, %v55_v30 }
 0x120   :  { %v69_v32 = vadd.f32 1e-05, %v65_v31 }
 0x121   :  { %v58_v33 = vpop.xlane.xlu1 %57  ;;  %v61_v34 = vpop.xlane.xlu0 %60 }
 0x122   :  { %235 = vrsqrt.f32 %v69_v32  ;;  %v66_v35 = vmul.f32 0.03125, %v58_v33  ;;  %v67_v36 = vmul.f32 0.03125, %v61_v34 }
 0x124   :  { %v70_v37 = vadd.f32 1e-05, %v66_v35  ;;  %v71_v38 = vadd.f32 1e-05, %v67_v36 }
 0x125   :  { %v64_v39 = vpop.xlane.xlu1 %63 }
 0x126   :  { %237 = vrsqrt.f32 %v70_v37  ;;  %v68_v40 = vmul.f32 0.03125, %v64_v39 }
 0x127   :  { %239 = vrsqrt.f32 %v71_v38 }
 0x128   :  { %v72_v41 = vadd.f32 1e-05, %v68_v40 }
 0x12a   :  { %241 = vrsqrt.f32 %v72_v41 }
 0x12f   :  { %v236_v42 = vpop.eup %235 }
 0x130   :  { %v77_v43 = vmul.f32 %v236_v42, %v45_v12 }
 0x132   :  { %v87_v48 = vmul.f32 %v206_v44, %v77_v43 }
 0x133   :  { %v238_v45 = vpop.eup %237 }
 0x134   :  { %v240_v46 = vpop.eup %239  ;;  %v78_v47 = vmul.f32 %v238_v45, %v46_v20  ;;  %v97_v53 = vadd.f32 %v207_v49, %v87_v48 }
 0x135   :  { %v79_v50 = vmul.f32 %v240_v46, %v47_v13 }
 0x136   :  { %v88_v51 = vmul.f32 %v206_v44, %v78_v47 }
 0x137   :  { %v242_v52 = vpop.eup %241  ;;  %v89_v56 = vmul.f32 %v206_v44, %v79_v50 }
 0x138   :  { %v98_v54 = vadd.f32 %v207_v49, %v88_v51  ;;  %v80_v55 = vmul.f32 %v242_v52, %v48_v21 }
 0x139   :  { %v99_v59 = vadd.f32 %v207_v49, %v89_v56 }
 0x13a   :  { %v101_v57 = vpack.c.bf16 %v98_v54, %v97_v53  ;;  %v90_v58 = vmul.f32 %v206_v44, %v80_v55 }
 0x13c   :  { %229 = vmatprep.mubr.msk.bf16.mxu0 %vm27_vm0, %v101_v57  ;;  %v100_v60 = vadd.f32 %v207_v49, %v90_v58 }
 0x13e   :  { %v102_v61 = vpack.c.bf16 %v100_v60, %v99_v59 }
 0x140   :  { %230 = vmatmul.mubr.msk.bf16.vlgmr.msra.gmra.mxu0 %vm27_vm0, %v102_v61 }
 0x200   :  { %v231_v63 = vpop.f32.mrf.mxu0 }
 0x201   :  { %v175_v0 = vadd.f32 %v231_v63, %v208_v62 }
 0x202   :  { %v166_v1 = vpop.f32.mrf.mxu0 }
 0x203   :  { %v219_v2 = vpack.c.bf16 %v175_v0, %v175_v0  ;;  %v167_v3 = vadd.f32 %v208_v62, %v166_v1 }
 0x204   :  { %v232_v4 = vpop.f32.mrf.mxu0 }
 0x205   :  { %200 = vst.msk [vmem:[%s327_s5 + $0x8] sm:$0xf] %vm197_vm1, %v219_v2  ;;  %v217_v5 = vpack.c.bf16 %v167_v3, %v167_v3  ;;  %v178_v6 = vadd.f32 %v232_v4, %v208_v62 }
 0x206   :  { %v169_v7 = vpop.f32.mrf.mxu0 }
 0x207   :  { %198 = vst.msk [vmem:[%s327_s5] sm:$0xf] %vm197_vm1, %v217_v5  ;;  %v220_v8 = vpack.c.bf16 %v178_v6, %v178_v6  ;;  %v170_v9 = vadd.f32 %v208_v62, %v169_v7 }
 0x209   :  { %201 = vst.msk [vmem:[%s327_s5 + $0xc] sm:$0xf] %vm197_vm1, %v220_v8  ;;  %v218_v10 = vpack.c.bf16 %v170_v9, %v170_v9 }
 0x20b   :  { %199 = vst.msk [vmem:[%s327_s5 + $0x4] sm:$0xf] %vm197_vm1, %v218_v10 }

// kernel: spatial_block_forward.5
= control target key start
LH: loop header
LB: loop body
LE: loop exit
PB: predicated region body
PF: predicated region fallthrough
CT: control target
= control target key end

     0   :  { %vm71_vm0 = vcmask 261120   ;;  %s895_s0 = inlined_call_operand.vmem [shape: bf16[32,32], index: 0, kind: input, shape index: {}]   ;;  %s896_s1 = inlined_call_operand.vmem [shape: f32[32,32], index: 1, kind: input, shape index: {}]   ;;  %s897_s2 = inlined_call_operand.vmem [shape: bf16[32,32], index: 2, kind: input, shape index: {}]   ;;  %s898_s3 = inlined_call_operand.vmem [shape: f32[1,32], index: 3, kind: input, shape index: {}]   ;;  %s899_s4 = inlined_call_operand.vmem [shape: f32[1,32], index: 4, kind: input, shape index: {}]   ;;  %s900_s5 = inlined_call_operand.vmem [shape: f32[1,32], index: 5, kind: input, shape index: {}]   ;;  %s901_s6 = inlined_call_operand.vmem [shape: bf16[32,128], index: 6, kind: input, shape index: {}]   ;;  %s902_s7 = inlined_call_operand.vmem [shape: f32[1,128], index: 7, kind: input, shape index: {}]   ;;  %s903_s8 = inlined_call_operand.vmem [shape: bf16[128,32], index: 8, kind: input, shape index: {}]   ;;  %s904_s9 = inlined_call_operand.vmem [shape: f32[1,32], index: 9, kind: input, shape index: {}]   ;;  %s905_s10 = inlined_call_operand.hbm [shape: f32[32,32], index: 10, kind: output, shape index: {}]  }
   0x1   :  { %v636_v0 = vld [vmem:[%s897_s2 + $0x8] sm:$0xff]   ;;  %v637_v1 = vld [vmem:[%s897_s2] sm:$0xff]  }
   0x2   :  { %596 = vmatprep.subr.bf16.mxu1 %v636_v0  ;;  %v638_v2 = vld [vmem:[%s895_s0] sm:$0xff]   ;;  %v639_v3 = vld [vmem:[%s895_s0 + $0x8] sm:$0xff]  }
   0x3   :  { %597 = vmatpush3.bf16.msra.mxu1 %v636_v0  ;;  %600 = vmatprep.mubr.msk.bf16.mxu1 %vm71_vm0, %v638_v2 }
   0x4   :  { %598 = vmatprep.subr.bf16.mxu1 %v637_v1 }
   0x7   :  { %599 = vmatpush3.bf16.msra.mxu1 %v637_v1 }
   0xa   :  { %601 = vmatmul.mubr.msk.bf16.vlgmr.msra.gmra.mxu1 %vm71_vm0, %v639_v3 }
   0xb   :  { %15 = vsyncpa [#allocation3], 0  ;;  %v39_v4 = vld [vmem:[%s896_s1 + $0x10] sm:$0xff]  ;;  %v561_v6 = vld [vmem:[%s898_s3] ss:$0 sm:$0xff]  ;;  %s697_s28 = smov [#allocation2]  }
   0xc   :  { %v37_v7 = vld [vmem:[%s896_s1] sm:$0xff]  ;;  %v40_v10 = vld [vmem:[%s896_s1 + $0x18] sm:$0xff]  ;;  %v38_v14 = vld [vmem:[%s896_s1 + $0x8] sm:$0xff]  ;;  %s544_s1 = sshll.u32 %s697_s28, 4  ;;  %s545_s1 = int_to_ptr.vmem [resolvable:$true] %s544_s1 }
   0xd   :  { %v640_v45 = vld [vmem:[%s901_s6 + $0x8] sm:$0xff]   ;;  %v641_v46 = vld [vmem:[%s901_s6] sm:$0xff]   ;;  %p679_p1 = scmp.lt.s32.totalorder %s545_s1, %s545_s1 }
   0xe   :  { %604 = vmatprep.subr.bf16.mxu1 %v640_v45  ;;  %v562_v61 = vld [vmem:[%s899_s4] ss:$0 sm:$0xff] }
   0xf   :  { %605 = vmatpush3.bf16.msra.mxu1 %v640_v45  ;;  %v563_v3 = vld [vmem:[%s900_s5] ss:$0 sm:$0xff] }
  0x10   :  { %606 = vmatprep.subr.bf16.mxu1 %v641_v46 }
  0x13   :  { %607 = vmatpush3.bf16.msra.mxu1 %v641_v46 }
  0xca   :  { %v602_v5 = vpop.f32.mrf.mxu1 }
  0xcb   :  { %v129_v8 = vadd.f32 %v602_v5, %v39_v4 }
  0xcc   :  { %v112_v9 = vpop.f32.mrf.mxu1 }
  0xcd   :  { %v781_v11 = vadd.f32 %v561_v6, %v129_v8  ;;  %v127_v12 = vadd.f32 %v112_v9, %v37_v7 }
  0xce   :  { %v603_v13 = vpop.f32.mrf.mxu1 }
  0xcf   :  { %v786_v15 = vadd.f32 %v561_v6, %v127_v12  ;;  %v130_v16 = vadd.f32 %v603_v13, %v40_v10  ;;  %v150_v17 = vsel %vm71_vm0, %v781_v11, 0.0 }
  0xd0   :  { %v115_v18 = vpop.f32.mrf.mxu1  ;;  %151 = vadd.xlane.f32.xlu1 %v150_v17  ;;  %v642_v17 = vld [vmem:[%s903_s8 + $0x38] sm:$0xff]  }
  0xd1   :  { %v790_v19 = vadd.f32 %v561_v6, %v130_v16  ;;  %v128_v20 = vadd.f32 %v115_v18, %v38_v14  ;;  %v144_v21 = vsel %vm71_vm0, %v786_v15, 0.0  ;;  %612 = vmatprep.subr.bf16.mxu0 %v642_v17  ;;  %v643_v18 = vld [vmem:[%s903_s8 + $0x30] sm:$0xff]  }
  0xd2   :  { %145 = vadd.xlane.f32.xlu0 %v144_v21  ;;  %613 = vmatpush3.bf16.msra.mxu0 %v642_v17  ;;  %v645_v21 = vld [vmem:[%s903_s8 + $0x20] sm:$0xff]  }
  0xd3   :  { %v794_v22 = vadd.f32 %v561_v6, %v128_v20  ;;  %v153_v23 = vsel %vm71_vm0, %v790_v19, 0.0  ;;  %614 = vmatprep.subr.bf16.mxu0 %v643_v18  ;;  %v644_v20 = vld [vmem:[%s903_s8 + $0x28] sm:$0xff]  }
  0xd4   :  { %154 = vadd.xlane.f32.xlu1 %v153_v23  ;;  %v646_v23 = vld [vmem:[%s903_s8 + $0x18] sm:$0xff]  }
  0xd5   :  { %v147_v24 = vsel %vm71_vm0, %v794_v22, 0.0 }
  0xd6   :  { %148 = vadd.xlane.f32.xlu0 %v147_v24  ;;  %615 = vmatpush3.bf16.msra.mxu0 %v643_v18  ;;  %v647_v24 = vld [vmem:[%s903_s8 + $0x10] sm:$0xff]  }
  0xd7   :  { %616 = vmatprep.subr.bf16.mxu0 %v644_v20 }
  0xda   :  { %617 = vmatpush3.bf16.msra.mxu0 %v644_v20 }
  0xdb   :  { %618 = vmatprep.subr.bf16.mxu0 %v645_v21 }
  0xde   :  { %619 = vmatpush3.bf16.msra.mxu0 %v645_v21 }
  0xdf   :  { %620 = vmatprep.subr.bf16.mxu0 %v646_v23 }
  0xe2   :  { %621 = vmatpush3.bf16.msra.mxu0 %v646_v23 }
  0xe3   :  { %622 = vmatprep.subr.bf16.mxu0 %v647_v24 }
  0xe6   :  { %623 = vmatpush3.bf16.msra.mxu0 %v647_v24 }
 0x159   :  { %v152_v25 = vpop.xlane.xlu1 %151 }
 0x15a   :  { %v159_v26 = vmul.f32 0.03125, %v152_v25  ;;  %v648_v25 = vld [vmem:[%s903_s8 + $0x8] sm:$0xff]  }
 0x15b   :  { %v146_v27 = vpop.xlane.xlu0 %145  ;;  %624 = vmatprep.subr.bf16.mxu0 %v648_v25 }
 0x15c   :  { %v157_v28 = vmul.f32 0.03125, %v146_v27  ;;  %v163_v30 = vsub.f32 %v781_v11, %v159_v26  ;;  %v649_v26 = vld [vmem:[%s903_s8] sm:$0xff]   ;;  %625 = vmatpush3.bf16.msra.mxu0 %v648_v25 }
 0x15d   :  { %v155_v29 = vpop.xlane.xlu1 %154  ;;  %626 = vmatprep.subr.bf16.mxu0 %v649_v26  ;;  %v564_v27 = vld [vmem:[%s902_s7] ss:$0 sm:$0xff] }
 0x15e   :  { %v161_v31 = vsub.f32 %v786_v15, %v157_v28  ;;  %v160_v32 = vmul.f32 0.03125, %v155_v29  ;;  %v167_v39 = vmul.f32 %v163_v30, %v163_v30 }
 0x15f   :  { %v149_v33 = vpop.xlane.xlu0 %148 }
 0x160   :  { %v158_v34 = vmul.f32 0.03125, %v149_v33  ;;  %v165_v35 = vmul.f32 %v161_v31, %v161_v31  ;;  %v164_v36 = vsub.f32 %v790_v19, %v160_v32  ;;  %v175_v41 = vsel %vm71_vm0, %v167_v39, 0.0  ;;  %627 = vmatpush3.bf16.msra.mxu0 %v649_v26 }
 0x162   :  { %v162_v37 = vsub.f32 %v794_v22, %v158_v34  ;;  %v169_v38 = vsel %vm71_vm0, %v165_v35, 0.0  ;;  %v168_v43 = vmul.f32 %v164_v36, %v164_v36 }
 0x163   :  { %170 = vadd.xlane.f32.xlu0 %v169_v38 }
 0x164   :  { %v166_v40 = vmul.f32 %v162_v37, %v162_v37  ;;  %v178_v44 = vsel %vm71_vm0, %v168_v43, 0.0 }
 0x166   :  { %v172_v42 = vsel %vm71_vm0, %v166_v40, 0.0 }
 0x167   :  { %176 = vadd.xlane.f32.xlu0 %v175_v41  ;;  %173 = vadd.xlane.f32.xlu1 %v172_v42 }
 0x16b   :  { %179 = vadd.xlane.f32.xlu1 %v178_v44 }
 0x1ec   :  { %v171_v47 = vpop.xlane.xlu0 %170 }
 0x1ed   :  { %v181_v48 = vmul.f32 0.03125, %v171_v47 }
 0x1ef   :  { %v185_v49 = vadd.f32 1e-05, %v181_v48 }
 0x1f0   :  { %v174_v50 = vpop.xlane.xlu1 %173  ;;  %v177_v51 = vpop.xlane.xlu0 %176 }
 0x1f1   :  { %650 = vrsqrt.f32 %v185_v49  ;;  %v182_v52 = vmul.f32 0.03125, %v174_v50  ;;  %v183_v53 = vmul.f32 0.03125, %v177_v51 }
 0x1f3   :  { %v186_v54 = vadd.f32 1e-05, %v182_v52  ;;  %v187_v55 = vadd.f32 1e-05, %v183_v53 }
 0x1f4   :  { %v180_v56 = vpop.xlane.xlu1 %179 }
 0x1f5   :  { %652 = vrsqrt.f32 %v186_v54  ;;  %v184_v57 = vmul.f32 0.03125, %v180_v56 }
 0x1f6   :  { %654 = vrsqrt.f32 %v187_v55 }
 0x1f7   :  { %v188_v58 = vadd.f32 1e-05, %v184_v57 }
 0x1f9   :  { %656 = vrsqrt.f32 %v188_v58 }
 0x1fe   :  { %v651_v59 = vpop.eup %650 }
 0x1ff   :  { %v193_v60 = vmul.f32 %v651_v59, %v161_v31 }
 0x201   :  { %v203_v1 = vmul.f32 %v562_v61, %v193_v60 }
 0x202   :  { %v653_v62 = vpop.eup %652 }
 0x203   :  { %v655_v63 = vpop.eup %654  ;;  %v194_v0 = vmul.f32 %v653_v62, %v162_v37  ;;  %v213_v7 = vadd.f32 %v563_v3, %v203_v1 }
 0x204   :  { %v195_v2 = vmul.f32 %v655_v63, %v163_v30 }
 0x205   :  { %v204_v4 = vmul.f32 %v562_v61, %v194_v0 }
 0x206   :  { %v657_v5 = vpop.eup %656  ;;  %v205_v9 = vmul.f32 %v562_v61, %v195_v2 }
 0x207   :  { %v196_v6 = vmul.f32 %v657_v5, %v164_v36  ;;  %v214_v8 = vadd.f32 %v563_v3, %v204_v4 }
 0x208   :  { %v215_v13 = vadd.f32 %v563_v3, %v205_v9 }
 0x209   :  { %v217_v10 = vpack.c.bf16 %v214_v8, %v213_v7  ;;  %v206_v12 = vmul.f32 %v562_v61, %v196_v6 }
 0x20b   :  { %608 = vmatprep.mubr.msk.bf16.mxu1 %vm71_vm0, %v217_v10  ;;  %v216_v14 = vadd.f32 %v563_v3, %v206_v12 }
 0x20d   :  { %v218_v16 = vpack.c.bf16 %v216_v14, %v215_v13 }
 0x20f   :  { %609 = vmatmul.mubr.msk.bf16.vlgmr.msra.gmra.mxu1 %vm71_vm0, %v218_v16 }
 0x2cf   :  { %v610_v28 = vpop.f32.mrf.mxu1 }
 0x2d0   :  { %v849_v29 = vadd.f32 %v610_v28, %v564_v27 }
 0x2d1   :  { %v282_v30 = vpop.f32.mrf.mxu1 }
 0x2d2   :  { %v852_v31 = vmul.f32 0.70710677, %v849_v29  ;;  %v854_v32 = vadd.f32 %v564_v27, %v282_v30 }
 0x2d3   :  { %v611_v33 = vpop.f32.mrf.mxu1 }
 0x2d4   :  { %v315_v34 = vand.u32 2147483647, %v852_v31  ;;  %v858_v35 = vmul.f32 0.70710677, %v854_v32  ;;  %v860_v36 = vadd.f32 %v611_v33, %v564_v27  ;;  %vm307_vm1 = vcmp.ge.f32.partialorder %v852_v31, 0.0 }
 0x2d5   :  { %v285_v37 = vpop.f32.mrf.mxu1 }
 0x2d6   :  { %v319_v38 = vmul.f32 0.3275911, %v315_v34  ;;  %v313_v39 = vand.u32 2147483647, %v858_v35  ;;  %v864_v40 = vmul.f32 0.70710677, %v860_v36  ;;  %v866_v41 = vadd.f32 %v564_v27, %v285_v37 }
 0x2d7   :  { %v371_v52 = vsub.f32 0.0, %v315_v34  ;;  %vm305_vm2 = vcmp.ge.f32.partialorder %v858_v35, 0.0 }
 0x2d8   :  { %v323_v42 = vadd.f32 1.0, %v319_v38  ;;  %v317_v43 = vmul.f32 0.3275911, %v313_v39  ;;  %v316_v44 = vand.u32 2147483647, %v864_v40  ;;  %v369_v53 = vsub.f32 0.0, %v313_v39 }
 0x2d9   :  { %v870_v45 = vmul.f32 0.70710677, %v866_v41  ;;  %v375_v54 = vmul.f32 %v371_v52, %v315_v34  ;;  %vm308_vm3 = vcmp.ge.f32.partialorder %v864_v40, 0.0 }
 0x2da   :  { %658 = vrcp.f32 %v323_v42  ;;  %v321_v46 = vadd.f32 1.0, %v317_v43  ;;  %v320_v47 = vmul.f32 0.3275911, %v316_v44  ;;  %v372_v55 = vsub.f32 0.0, %v316_v44 }
 0x2db   :  { %v314_v48 = vand.u32 2147483647, %v870_v45  ;;  %v373_v57 = vmul.f32 %v369_v53, %v313_v39  ;;  %v381_v60 = vmul.f32 1.442695, %v375_v54  ;;  %vm306_vm4 = vcmp.ge.f32.partialorder %v870_v45, 0.0 }
 0x2dc   :  { %660 = vrcp.f32 %v321_v46  ;;  %v324_v49 = vadd.f32 1.0, %v320_v47  ;;  %v376_v61 = vmul.f32 %v372_v55, %v316_v44 }
 0x2dd   :  { %v318_v50 = vmul.f32 0.3275911, %v314_v48  ;;  %v370_v59 = vsub.f32 0.0, %v314_v48  ;;  %v377_v0 = vmul.f32 1.442695, %v373_v57 }
 0x2de   :  { %662 = vrcp.f32 %v324_v49  ;;  %v383_v6 = vmul.f32 1.442695, %v376_v61  ;;  %v696_v61 = vmov -1.0  }
 0x2df   :  { %v322_v51 = vadd.f32 1.0, %v318_v50  ;;  %v374_v4 = vmul.f32 %v370_v59, %v314_v48 }
 0x2e1   :  { %664 = vrcp.f32 %v322_v51  ;;  %v379_v14 = vmul.f32 1.442695, %v374_v4 }
 0x2e2   :  { %666 = vpow2.f32 %v381_v60 }
 0x2e3   :  { %668 = vpow2.f32 %v377_v0  ;;  %v309_v0 = vsel %vm305_vm2, 1.0, %v696_v61 }
 0x2e4   :  { %670 = vpow2.f32 %v383_v6  ;;  %v310_v6 = vsel %vm306_vm4, 1.0, %v696_v61 }
 0x2e5   :  { %672 = vpow2.f32 %v379_v14  ;;  %v299_v14 = vmul.f32 0.5, %v849_v29 }
 0x2e7   :  { %v659_v56 = vpop.eup %658 }
 0x2e8   :  { %v335_v58 = vmul.f32 1.0614054, %v659_v56 }
 0x2e9   :  { %v661_v62 = vpop.eup %660 }
 0x2ea   :  { %v339_v63 = vadd.f32 -1.4531521, %v335_v58  ;;  %v333_v1 = vmul.f32 1.0614054, %v661_v62 }
 0x2eb   :  { %v663_v2 = vpop.eup %662 }
 0x2ec   :  { %v343_v3 = vmul.f32 %v659_v56, %v339_v63  ;;  %v336_v5 = vmul.f32 1.0614054, %v663_v2  ;;  %v337_v7 = vadd.f32 -1.4531521, %v333_v1  ;;  %v311_v63 = vsel %vm307_vm1, 1.0, %v696_v61 }
 0x2ed   :  { %v312_v1 = vsel %vm308_vm3, 1.0, %v696_v61 }
 0x2ee   :  { %v347_v8 = vadd.f32 1.4214138, %v343_v3  ;;  %v665_v9 = vpop.eup %664  ;;  %v340_v10 = vadd.f32 -1.4531521, %v336_v5  ;;  %v341_v12 = vmul.f32 %v661_v62, %v337_v7 }
 0x2ef   :  { %v334_v16 = vmul.f32 1.0614054, %v665_v9  ;;  %v667_v44 = vpop.eup %666 }
 0x2f0   :  { %v351_v13 = vmul.f32 %v659_v56, %v347_v8  ;;  %v344_v17 = vmul.f32 %v663_v2, %v340_v10  ;;  %v345_v18 = vadd.f32 1.4214138, %v341_v12  ;;  %v669_v50 = vpop.eup %668  ;;  %v297_v10 = vmul.f32 0.5, %v854_v32 }
 0x2f1   :  { %v338_v21 = vadd.f32 -1.4531521, %v334_v16  ;;  %v671_v54 = vpop.eup %670  ;;  %v298_v12 = vmul.f32 0.5, %v866_v41 }
 0x2f2   :  { %v355_v20 = vadd.f32 -0.28449672, %v351_v13  ;;  %v348_v23 = vadd.f32 1.4214138, %v344_v17  ;;  %v349_v24 = vmul.f32 %v661_v62, %v345_v18  ;;  %v673_v60 = vpop.eup %672 }
 0x2f3   :  { %v342_v26 = vmul.f32 %v665_v9, %v338_v21 }
 0x2f4   :  { %v359_v25 = vmul.f32 %v659_v56, %v355_v20  ;;  %v352_v27 = vmul.f32 %v663_v2, %v348_v23  ;;  %v353_v28 = vadd.f32 -0.28449672, %v349_v24 }
 0x2f5   :  { %v346_v33 = vadd.f32 1.4214138, %v342_v26 }
 0x2f6   :  { %v363_v30 = vadd.f32 0.2548296, %v359_v25  ;;  %v356_v34 = vadd.f32 -0.28449672, %v352_v27  ;;  %v357_v37 = vmul.f32 %v661_v62, %v353_v28 }
 0x2f7   :  { %v350_v39 = vmul.f32 %v665_v9, %v346_v33 }
 0x2f8   :  { %v367_v38 = vmul.f32 %v659_v56, %v363_v30  ;;  %v360_v42 = vmul.f32 %v663_v2, %v356_v34  ;;  %v361_v43 = vadd.f32 0.2548296, %v357_v37 }
 0x2f9   :  { %v354_v46 = vadd.f32 -0.28449672, %v350_v39 }
 0x2fa   :  { %v387_v47 = vmul.f32 %v667_v44, %v367_v38  ;;  %v364_v48 = vadd.f32 0.2548296, %v360_v42  ;;  %v365_v49 = vmul.f32 %v661_v62, %v361_v43 }
 0x2fb   :  { %v358_v51 = vmul.f32 %v665_v9, %v354_v46 }
 0x2fc   :  { %v368_v52 = vmul.f32 %v663_v2, %v364_v48  ;;  %v385_v53 = vmul.f32 %v669_v50, %v365_v49  ;;  %v391_v57 = vsub.f32 1.0, %v387_v47 }
 0x2fd   :  { %v362_v55 = vadd.f32 0.2548296, %v358_v51 }
 0x2fe   :  { %v388_v56 = vmul.f32 %v671_v54, %v368_v52  ;;  %v389_v58 = vsub.f32 1.0, %v385_v53  ;;  %v395_v31 = vmul.f32 %v391_v57, %v311_v63 }
 0x2ff   :  { %v366_v59 = vmul.f32 %v665_v9, %v362_v55  ;;  %v300_v9 = vmul.f32 0.5, %v860_v36  ;;  %v577_v36 = vld [vmem:[%s904_s9] ss:$0 sm:$0xff]  ;;  %s674_s9 = scalar_lea.vmem %s545_s1, 512 }
 0x300   :  { %v392_v62 = vsub.f32 1.0, %v388_v56  ;;  %v393_v3 = vmul.f32 %v389_v58, %v309_v0  ;;  %v399_v8 = vadd.f32 1.0, %v395_v31  ;;  %p675_p0 = scmp.ne.s32.totalorder %s545_s1, %s674_s9  ;;  %p680_p2 = scmp.lt.s32.totalorder %s674_s9, %s674_s9 }
 0x301   :  { %v386_v2 = vmul.f32 %v673_v60, %v366_v59 }
 0x302   :  { %v396_v4 = vmul.f32 %v392_v62, %v312_v1  ;;  %v397_v40 = vadd.f32 1.0, %v393_v3  ;;  %v403_v18 = vmul.f32 %v399_v8, %v299_v14  ;;  %p681_p3 = por %p680_p2, %p679_p1 }
 0x303   :  { %v390_v35 = vsub.f32 1.0, %v386_v2 }
 0x304   :  { %v400_v5 = vadd.f32 1.0, %v396_v4  ;;  %v401_v16 = vmul.f32 %v397_v40, %v297_v10  ;;  %p682_p4 = pnand %p681_p3, %p675_p0 }
 0x305   :  { %v394_v7 = vmul.f32 %v390_v35, %v310_v6 }
 0x306   :  { %v404_v45 = vmul.f32 %v400_v5, %v300_v9 }
 0x307   :  { %v398_v13 = vadd.f32 1.0, %v394_v7 }
 0x308   :  { %v406_v21 = vpack.c.bf16 %v404_v45, %v403_v18 }
 0x309   :  { %v402_v17 = vmul.f32 %v398_v13, %v298_v12 }
 0x30b   :  { %v405_v20 = vpack.c.bf16 %v402_v17, %v401_v16 }
 0x30d   :  { %628 = vmatprep.mubr.bf16.mxu0 %v405_v20 }
 0x30e   :  { %629 = vmatmul.mubr.bf16.vlgmr.msra.gmra.mxu0 %v406_v21 }
 0x3ce   :  { %v630_v23 = vpop.f32.mrf.mxu0 }
 0x3cf   :  { %v522_v32 = vadd.f32 %v630_v23, %v781_v11 }
 0x3d0   :  { %v505_v24 = vpop.f32.mrf.mxu0 }
 0x3d1   :  { %v533_v41 = vadd.f32 %v577_v36, %v522_v32  ;;  %v520_v25 = vadd.f32 %v505_v24, %v786_v15 }
 0x3d2   :  { %v631_v29 = vpop.f32.mrf.mxu0 }
 0x3d3   :  { %537 = vst.msk [vmem:[#allocation2 + $0x10] sm:$0xff] %vm71_vm0, %v533_v41  ;;  %v531_v26 = vadd.f32 %v577_v36, %v520_v25  ;;  %v523_v27 = vadd.f32 %v631_v29, %v790_v19 }
 0x3d4   :  { %v508_v28 = vpop.f32.mrf.mxu0 }
 0x3d5   :  { %535 = vst.msk [vmem:[#allocation2] sm:$0xff] %vm71_vm0, %v531_v26  ;;  %v534_v30 = vadd.f32 %v577_v36, %v523_v27  ;;  %v521_v33 = vadd.f32 %v508_v28, %v794_v22 }
 0x3d7   :  { %538 = vst.msk [vmem:[#allocation2 + $0x18] sm:$0xff] %vm71_vm0, %v534_v30  ;;  %v532_v11 = vadd.f32 %v577_v36, %v521_v33 }
 0x3d9   :  { %536 = vst.msk [vmem:[#allocation2 + $0x8] sm:$0xff] %vm71_vm0, %v532_v11 }
 0x3da   :  { %685 = shalt.err (!%p682_p4)
}
 0x3db   :  { %s698_s3 = smov 128   ;;  %s699_s29 = smov 8  }
 0x3dc   :  { %550 = dma.vmem_to_hbm [thread:$0]  %s545_s1, 512, %s905_s10, [#allocation3], %s698_s3, %s698_s3, %s699_s29  }
 0x3dd   :  { %694 = dma.done.wait [#allocation3], 512  }
 0x3de   :  { %695 = vsyncadd [#allocation3], 4294966784 }
 0x3df   :  { %554 = vsyncpa [#allocation3], 1 }

// kernel: spatial_block_forward.4
= control target key start
LH: loop header
LB: loop body
LE: loop exit
PB: predicated region body
PF: predicated region fallthrough
CT: control target
= control target key end

     0   :  { %11 = vsyncpa [#allocation3], 0  ;;  %s1783_s21 = smov 0   ;;  %s1785_s22 = smov 0   ;;  %s2066_s0 = inlined_call_operand.vmem [shape: f32[4], index: 0, kind: input, shape index: {}]   ;;  %s2067_s1 = inlined_call_operand.vmem [shape: bf16[2,16,96], index: 1, kind: input, shape index: {}]   ;;  %s2068_s2 = inlined_call_operand.vmem [shape: f32[2,4,16], index: 2, kind: input, shape index: {}]   ;;  %s2069_s3 = inlined_call_operand.vmem [shape: bf16[2,16,16], index: 3, kind: input, shape index: {}]   ;;  %s2070_s4 = inlined_call_operand.vmem [shape: s16[2,16,16], index: 4, kind: input, shape index: {}]   ;;  %s2071_s5 = inlined_call_operand.vmem [shape: s16[2,16,16], index: 5, kind: input, shape index: {}]   ;;  %s2072_s6 = inlined_call_operand.vmem [shape: bf16[2,16,32], index: 6, kind: output, shape index: {}]  }
   0x1   :  { %s1787_s23 = smov 0  }
   0x2 LB: > { %s1421_s24 = sadd.s32 4294967295, %s1729_s23   ;;  %s29_s25 = sadd.s32 1, %s1725_s22  ;;  %s1729_s23 = sphi %s1787_s23, %s17_s23   ;;  %s1725_s22 = sphi %s1785_s22, %s2076_s22   ;;  %s1721_s21 = sphi %s1783_s21, %s2075_s21  }
   0x3   : > { %p31_p0 = scmp.ge.s32.totalorder %s29_s25, 2  ;;  %p1423_p1 = scmp.ge.s32.totalorder %s1729_s23, 1 }
   0x4   : > { %p219_p2 = scmp.lt.s32.totalorder %s1729_s23, 3  ;;  %p1808_p4 = scmp.eq.s32.totalorder %s1421_s24, 0 }
   0x5   : > { %s2078_s25 = smov (%p31_p0, %s29_s25), 0  ;;  %s232_s30 = sshll.u32 %s2066_s0, 4  ;;  %s233_s30 = int_to_ptr.vmem [resolvable:$true] %s232_s30 }
   0x6   : > { %p1804_p3 = pnand %p1423_p1, %p219_p2  ;;  %s1688_s7 = scalar_lea.vmem %s233_s30, 16 }
   0x7   : > { %p1689_p7 = scmp.ne.s32.totalorder %s233_s30, %s1688_s7  ;;  %p1696_p11 = scmp.lt.s32.totalorder %s233_s30, %s233_s30 }
   0x8   : > { %p1581_p5 = pneg %p1804_p3  ;;  %p1697_p12 = scmp.lt.s32.totalorder %s1688_s7, %s1688_s7 }
   0xa   : > { %p1582_p6 = pnand %p1808_p4, %p1581_p5  ;;  %p1698_p13 = por %p1697_p12, %p1696_p11 }
   0xc   : > { %p1690_p8 = pneg %p1582_p6 }
   0xe   : > { %p1691_p9 = pnand %p1690_p8, %p1689_p7 }
  0x10   : > { %p1692_p10 = pneg %p1691_p9 }
  0x12   : > { %p1699_p0 = pnand %p1698_p13, %p1692_p10 }
  0x14   : > { %1702 = shalt.err (!%p1699_p0)
}
  0x15   : > { %s1731_s8 = smov [#allocation2]   ;;  %299 = sbr.rel (%p1804_p3) target bundleno = 1268 (0x4f4), region = 44 }
  0x16   : > { %1584 = dma.vmem_to_smem (!%p1582_p6), %s233_s30, 16, %s1731_s8, [#allocation3]  }
  0x1a   : > { %1716 = dma.done.wait (%p1808_p4), [#allocation3], 16  }
  0x1b   : > { %1718 = vsyncadd (%p1808_p4), [#allocation3], 4294967280 }
  0x1c   : > { %305 = sfence }
  0x1d   : > { %p365_p1 = scmp.lt.s32.totalorder %s1721_s21, 1  ;;  %v1732_v0 = vmov 0.0   ;;  %vm1733_vm0 = vmmov 0   ;;  %s1734_s13 = smov 96   ;;  %vm449_vm1 = vcmask 64512   ;;  %vm544_vm2 = vcmask 130048  }
  0x1e   : > { %1529 = vmatprep.subr.bf16.mxu0 %v1732_v0  ;;  %1531 = vmatprep.mubr.msk.bf16.mxu0 %vm1733_vm0, %v1732_v0  ;;  %s1735_s14 = smov 64   ;;  %s1736_s15 = smov 80  }
  0x1f   : > { %s2080_s21 = smov (!%p365_p1, %s1721_s21), 1  ;;  %1535 = vmatprep.subr.bf16.mxu1 %v1732_v0  ;;  %1537 = vmatprep.mubr.msk.bf16.mxu1 %vm1733_vm0, %v1732_v0  ;;  %s1737_s16 = smov 112  }
  0x20   : > { %s1836_s9 = sshll.u32 %s2080_s21, 3  ;;  %s1430_s17 = sshll.u32 %s2080_s21, 2 }
  0x21   : > { %s1842_s12 = scalar_lea.vmem %s2067_s1, %s1836_s9  ;;  %s1864_s20 = scalar_lea.vmem %s2068_s2, %s1430_s17 }
  0x22   : > { %v1628_v1 = vld [vmem:[%s1842_s12] sm:$0xff]   ;;  %s1738_s21 = smov 88   ;;  %s1739_s24 = smov 104  }
  0x23   : > { %v433_v2 = vld [vmem:[%s1842_s12] sm:$0xff]   ;;  %447 = vrot.lane.b32.xlu0 %v1628_v1, %s1734_s13  ;;  %s1740_s26 = smov 120   ;;  %s1741_s27 = smov 72  }
  0x24   : > { %v498_v3 = vunpack.c.h.bf16 %v433_v2  ;;  %v497_v6 = vunpack.c.l.bf16 %v433_v2  ;;  %v1854_v11 = vld [vmem:[%s1842_s12] sm:$0xff]   ;;  %s428_s28 = sld [smem:[#allocation2]]  ;;  %s382_s7 = scalar_lea.vmem %s2069_s3, %s1836_s9 }
  0x25   : > { %v841_v14 = vld [vmem:[%s1842_s12] sm:$0xff]   ;;  %s1743_s17 = smov 48   ;;  %s1744_s18 = smov 40  }
  0x26   : > { %v500_v4 = vmul.f32 %v498_v3, %v498_v3  ;;  %v499_v7 = vmul.f32 %v497_v6, %v497_v6  ;;  %v906_v15 = vunpack.c.l.bf16 %v841_v14  ;;  %v1442_v22 = vld [vmem:[%s1864_s20] ss:$0 sm:$0xff]  ;;  %v907_v43 = vunpack.c.h.bf16 %v841_v14  ;;  %s1450_s19 = sld [smem:[#allocation2 + $0x1]]  ;;  %s2044_s30 = scalar_lea.vmem %s2072_s6, %s1836_s9 }
  0x27   : > { %v1870_v33 = vld [vmem:[%s1842_s12] sm:$0xff]  }
  0x28   : > { %v504_v5 = vsel %vm449_vm1, %v500_v4, 0.0  ;;  %v501_v8 = vsel %vm449_vm1, %v499_v7, 0.0  ;;  %v908_v16 = vmul.f32 %v906_v15, %v906_v15  ;;  %v1051_v34 = vld [vmem:[%s1842_s12] sm:$0xff]   ;;  %v909_v44 = vmul.f32 %v907_v43, %v907_v43 }
  0x29   : > { %505 = vadd.xlane.f32.xlu1 %v504_v5  ;;  %v631_v35 = vld [vmem:[%s1842_s12] sm:$0xff]   ;;  %v1116_v36 = vunpack.c.l.bf16 %v1051_v34  ;;  %v1117_v45 = vunpack.c.h.bf16 %v1051_v34 }
  0x2a   : > { %v1877_v38 = vld [vmem:[%s1842_s12] sm:$0xff]   ;;  %v696_v39 = vunpack.c.l.bf16 %v631_v35  ;;  %v697_v41 = vunpack.c.h.bf16 %v631_v35  ;;  %s520_s8 = ssub.f32 0.0, %s428_s28  ;;  %s392_s12 = scalar_lea.vmem %s2070_s4, %s1836_s9 }
  0x2b   : > { %v1118_v37 = vmul.f32 %v1116_v36, %v1116_v36  ;;  %v1119_v46 = vmul.f32 %v1117_v45, %v1117_v45  ;;  %v1502_v47 = vld [vmem:[%s382_s7] sm:$0xff]   ;;  %s1746_s7 = smov 16  }
  0x2c   : > { %v698_v40 = vmul.f32 %v696_v39, %v696_v39  ;;  %v699_v42 = vmul.f32 %v697_v41, %v697_v41  ;;  %v1885_v48 = vunpack.c.l.bf16 %v1502_v47  ;;  %v1887_v49 = vunpack.c.h.bf16 %v1502_v47  ;;  %v1506_v57 = vld [vmem:[%s392_s12] sm:$0xff]  }
  0x2d   : > { %v521_v50 = vstv %s520_s8  ;;  %v1899_v61 = vunpack.c.l.b16 %v1506_v57  ;;  %v1901_v63 = vunpack.c.h.b16 %v1506_v57  ;;  %s1747_s8 = smov 24  }
  0x2e   : > { %v522_v51 = vmul.f32 %v1885_v48, %v521_v50  ;;  %v523_v52 = vmul.f32 %v1887_v49, %v521_v50 }
  0x2f   : > { %vm530_vm3 = vcmp.lt.s32.totalorder %v1899_v61, 3  ;;  %vm531_vm4 = vcmp.lt.s32.totalorder %v1901_v63, 3  ;;  %vm737_vm7 = vcmp.lt.s32.totalorder %v1899_v61, 5  ;;  %vm738_vm9 = vcmp.lt.s32.totalorder %v1901_v63, 5 }
  0x30   : > { %v524_v53 = vmul.f32 1.442695, %v522_v51  ;;  %v526_v54 = vmul.f32 1.442695, %v523_v52  ;;  %v1443_v7 = vsel %vm530_vm3, 1.0, %v1732_v0  ;;  %vm948_vm11 = vcmp.lt.s32.totalorder %v1901_v63, 8 }
  0x31   : > { %vm1158_vm13 = vcmp.lt.s32.totalorder %v1901_v63, 11  ;;  %vm947_vm15 = vcmp.lt.s32.totalorder %v1899_v61, 8  ;;  %vm1157_vm3 = vcmp.lt.s32.totalorder %v1899_v61, 11 }
  0x32   : > { %1640 = vpow2.f32 %v524_v53 }
  0x33   : > { %1642 = vpow2.f32 %v526_v54 }
  0x3a   : > { %568 = vrot.lane.b32.xlu1 %v1628_v1, %s1735_s14 }
  0x3f   : > { %v1641_v5 = vpop.eup %1640 }
  0x40   : > { %v1643_v6 = vpop.eup %1642 }
  0x42   : > { %502 = vadd.xlane.f32.xlu0 %v501_v8  ;;  %v1444_v8 = vsel %vm531_vm4, 1.0, %v1732_v0 }
  0x58   : > { %857 = vrot.lane.b32.xlu0 %v1854_v11, %s1736_s15  ;;  %s402_s15 = scalar_lea.vmem %s2071_s5, %s1836_s9  ;;  %s1745_s9 = smov 8  }
  0x59   : > { %v1510_v58 = vld [vmem:[%s402_s15] sm:$0xff]  }
  0x5a   : > { %v1903_v1 = vunpack.c.l.b16 %v1510_v58 }
  0x5c   : > { %912 = vrot.lane.b32.xlu0 %v908_v16, %s1737_s16  ;;  %vm536_vm5 = vcmp.lt.s32.totalorder %v1903_v1, 3  ;;  %vm743_vm8 = vcmp.lt.s32.totalorder %v1903_v1, 5  ;;  %vm1163_vm4 = vcmp.lt.s32.totalorder %v1903_v1, 11 }
  0x60   : > { %1122 = vrot.lane.b32.xlu0 %v1118_v37, %s1739_s24 }
  0x95   : > { %v448_v9 = vpop.permute.xlu0 %447 }
  0x96   : > { %v454_v10 = vsel %vm449_vm1, %v448_v9, 0  ;;  %v1445_v9 = vsel %vm536_vm5, 1.0, %v1732_v0  ;;  %vm1047_vm5 = vcmask 191616  }
  0x97   : > { %1530 = vmatpush3.bf16.xpose.msra.mxu0 %v454_v10  ;;  %v542_v15 = vadd.f32 %v1445_v9, %v1443_v7 }
  0x98   : > { %1547 = vmatprep.subr.bf16.mxu0 %v1732_v0 }
  0x9e   : > { %1532 = vmatmul.mubr.msk.bf16.vlgmr.msra.gmra.mxu0 %vm449_vm1, %v433_v2  ;;  %v1905_v2 = vunpack.c.h.b16 %v1510_v58  ;;  %v1454_v58 = vld [vmem:[%s1864_s20 + $0x1] ss:$0 sm:$0xff] }
  0x9f   : > { %1549 = vmatprep.mubr.msk.bf16.mxu0 %vm1733_vm0, %v1732_v0 }
  0xa0   : > { %vm537_vm6 = vcmp.lt.s32.totalorder %v1905_v2, 3  ;;  %vm744_vm10 = vcmp.lt.s32.totalorder %v1905_v2, 5  ;;  %vm954_vm12 = vcmp.lt.s32.totalorder %v1905_v2, 8  ;;  %vm1164_vm14 = vcmp.lt.s32.totalorder %v1905_v2, 11 }
  0xa1   : > { %v1446_v10 = vsel %vm537_vm6, 1.0, %v1732_v0  ;;  %vm1257_vm6 = vcmask 257216  }
  0xa2   : > { %v543_v16 = vadd.f32 %v1446_v10, %v1444_v8 }
  0xb2   : > { %v506_v12 = vpop.xlane.xlu1 %505 }
  0xb3   : > { %v511_v24 = vmul.f32 0.17677669, %v506_v12 }
  0xb6   : > { %v569_v13 = vpop.permute.xlu1 %568 }
  0xb7   : > { %1536 = vmatpush3.bf16.msra.mxu1 %v569_v13  ;;  %v528_v13 = vadd.f32 1e-06, %v1641_v5 }
  0xb8   : > { %1541 = vmatprep.subr.bf16.mxu1 %v1732_v0 }
  0xcb   : > { %v503_v17 = vpop.xlane.xlu0 %502 }
  0xcc   : > { %v510_v18 = vmul.f32 0.17677669, %v503_v17 }
 0x15e   : > { %v490_v19 = vpop.f32.mrf.mxu0 }
 0x15f   : > { %v508_v20 = vmul.f32 0.35355338, %v490_v19 }
 0x160   : > { %v1533_v21 = vpop.f32.mrf.mxu0 }
 0x161   : > { %v512_v23 = vsub.f32 %v508_v20, %v510_v18  ;;  %v557_v18 = vmul.f32 %v542_v15, %v528_v13 }
 0x162   : > { %v493_v25 = vpop.f32.mrf.mxu0 }
 0x163   : > { %v509_v26 = vmul.f32 0.35355338, %v493_v25  ;;  %v518_v27 = vadd.f32 %v1442_v22, %v512_v23  ;;  %v858_v25 = vpop.permute.xlu0 %857 }
 0x164   : > { %v1534_v28 = vpop.f32.mrf.mxu0  ;;  %v863_v36 = vsel %vm449_vm1, %v858_v25, 0 }
 0x165   : > { %v513_v29 = vsub.f32 %v509_v26, %v511_v24  ;;  %v545_v30 = vsel %vm544_vm2, %v518_v27, -inf }
 0x166   : > { %546 = vmax.xlane.f32.xlu1 %v545_v30 }
 0x167   : > { %v519_v31 = vadd.f32 %v1442_v22, %v513_v29  ;;  %v913_v30 = vpop.permute.xlu0 %912 }
 0x169   : > { %v548_v32 = vsel %vm544_vm2, %v519_v31, -inf }
 0x16a   : > { %549 = vmax.xlane.f32.xlu1 %v548_v32  ;;  %v918_v32 = vsel %vm449_vm1, %v913_v30, 0.0  ;;  %v1478_v30 = vld [vmem:[%s1864_s20 + $0x3] ss:$0 sm:$0xff] }
 0x17b   : > { %647 = vrot.lane.b32.xlu1 %v1870_v33, %s1738_s21  ;;  %s1462_s21 = sld [smem:[#allocation2 + $0x2]] }
 0x17f   : > { %640 = vrot.lane.b32.xlu1 %v631_v35, %s1740_s26  ;;  %v1123_v35 = vpop.permute.xlu0 %1122 }
 0x180   : > { %v1128_v39 = vsel %vm449_vm1, %v1123_v35, 0.0 }
 0x183   : > { %850 = vrot.lane.b32.xlu1 %v841_v14, %s1737_s16  ;;  %v529_v14 = vadd.f32 1e-06, %v1643_v6 }
 0x185   : > { %v558_v19 = vmul.f32 %v543_v16, %v529_v14 }
 0x187   : > { %1067 = vrot.lane.b32.xlu1 %v1877_v38, %s1741_s27 }
 0x18b   : > { %1060 = vrot.lane.b32.xlu1 %v1051_v34, %s1739_s24 }
 0x18f   : > { %702 = vrot.lane.b32.xlu1 %v698_v40, %s1740_s26 }
 0x193   : > { %704 = vrot.lane.b32.xlu1 %v699_v42, %s1740_s26  ;;  %s1474_s26 = sld [smem:[#allocation2 + $0x3]] }
 0x197   : > { %914 = vrot.lane.b32.xlu1 %v909_v44, %s1737_s16  ;;  %s1742_s16 = smov 56  }
 0x199   : > { %s1147_s27 = ssub.f32 0.0, %s1474_s26 }
 0x19b   : > { %1124 = vrot.lane.b32.xlu1 %v1119_v46, %s1739_s24  ;;  %s937_s24 = ssub.f32 0.0, %s1462_s21 }
 0x1ef   : > { %v547_v55 = vpop.xlane.xlu1 %546 }
 0x1f0   : > { %v551_v56 = vsub.f32 %v518_v27, %v547_v55 }
 0x1f2   : > { %v553_v59 = vmul.f32 1.442695, %v551_v56 }
 0x1f3   : > { %v550_v60 = vpop.xlane.xlu1 %549 }
 0x1f4   : > { %v552_v62 = vsub.f32 %v519_v31, %v550_v60  ;;  %1644 = vpow2.f32 %v553_v59 }
 0x1f6   : > { %v555_v3 = vmul.f32 1.442695, %v552_v62 }
 0x1f7   : > { %v648_v4 = vpop.permute.xlu1 %647 }
 0x1f8   : > { %1646 = vpow2.f32 %v555_v3  ;;  %v653_v27 = vsel %vm449_vm1, %v648_v4, 0 }
 0x1fb   : > { %v641_v12 = vpop.permute.xlu1 %640 }
 0x1ff   : > { %v851_v17 = vpop.permute.xlu1 %850 }
 0x201   : > { %v1645_v20 = vpop.eup %1644 }
 0x202   : > { %v1915_v23 = vmul.f32 %v1645_v20, %v557_v18  ;;  %v1466_v18 = vld [vmem:[%s1864_s20 + $0x2] ss:$0 sm:$0xff]  ;;  %s727_s20 = ssub.f32 0.0, %s1450_s19 }
 0x203   : > { %v1068_v21 = vpop.permute.xlu1 %1067 }
 0x204   : > { %v1073_v43 = vsel %vm449_vm1, %v1068_v21, 0 }
 0x205   : > { %v1647_v22 = vpop.eup %1646 }
 0x206   : > { %v1917_v24 = vmul.f32 %v1647_v22, %v558_v19 }
 0x207   : > { %v1061_v26 = vpop.permute.xlu1 %1060 }
 0x208   : > { %v567_v28 = vpack.c.bf16 %v1917_v24, %v1915_v23 }
 0x20a   : > { %1538 = vmatmul.mubr.msk.bf16.vlgmr.msra.gmra.mxu1 %vm544_vm2, %v567_v28 }
 0x20b   : > { %1542 = vmatpush3.bf16.xpose.msra.mxu1 %v653_v27  ;;  %1543 = vmatprep.mubr.msk.bf16.mxu1 %vm1733_vm0, %v1732_v0  ;;  %v703_v29 = vpop.permute.xlu1 %702 }
 0x20c   : > { %1553 = vmatprep.subr.bf16.mxu1 %v1732_v0  ;;  %v708_v31 = vsel %vm449_vm1, %v703_v29, 0.0 }
 0x20d   : > { %709 = vadd.xlane.f32.xlu0 %v708_v31 }
 0x20f   : > { %v705_v34 = vpop.permute.xlu1 %704 }
 0x210   : > { %v711_v37 = vsel %vm449_vm1, %v705_v34, 0.0 }
 0x211   : > { %712 = vadd.xlane.f32.xlu1 %v711_v37  ;;  %919 = vadd.xlane.f32.xlu0 %v918_v32 }
 0x212   : > { %1544 = vmatmul.mubr.msk.bf16.vlgmr.msra.gmra.mxu1 %vm449_vm1, %v641_v12 }
 0x213   : > { %1554 = vmatpush3.bf16.xpose.msra.mxu1 %v863_v36  ;;  %1555 = vmatprep.mubr.msk.bf16.mxu1 %vm1733_vm0, %v1732_v0  ;;  %v915_v40 = vpop.permute.xlu1 %914 }
 0x214   : > { %1565 = vmatprep.subr.bf16.mxu1 %v1732_v0  ;;  %v921_v41 = vsel %vm449_vm1, %v915_v40, 0.0 }
 0x215   : > { %922 = vadd.xlane.f32.xlu0 %v921_v41  ;;  %1129 = vadd.xlane.f32.xlu1 %v1128_v39 }
 0x217   : > { %v1125_v42 = vpop.permute.xlu1 %1124 }
 0x218   : > { %v1131_v44 = vsel %vm449_vm1, %v1125_v42, 0.0 }
 0x219   : > { %1132 = vadd.xlane.f32.xlu0 %v1131_v44 }
 0x21a   : > { %1556 = vmatmul.mubr.msk.bf16.vlgmr.msra.gmra.mxu1 %vm449_vm1, %v851_v17 }
 0x21b   : > { %1566 = vmatpush3.bf16.xpose.msra.mxu1 %v1073_v43  ;;  %1567 = vmatprep.mubr.msk.bf16.mxu1 %vm1733_vm0, %v1732_v0 }
 0x222   : > { %1568 = vmatmul.mubr.msk.bf16.vlgmr.msra.gmra.mxu1 %vm449_vm1, %v1061_v26  ;;  %vm953_vm1 = vcmp.lt.s32.totalorder %v1903_v1, 8 }
 0x296   : > { %v710_v50 = vpop.xlane.xlu0 %709 }
 0x297   : > { %v717_v52 = vmul.f32 0.17677669, %v710_v50 }
 0x29a   : > { %v713_v54 = vpop.xlane.xlu1 %712  ;;  %v920_v57 = vpop.xlane.xlu0 %919 }
 0x29b   : > { %v718_v60 = vmul.f32 0.17677669, %v713_v54  ;;  %v927_v37 = vmul.f32 0.17677669, %v920_v57 }
 0x29e   : > { %v923_v9 = vpop.xlane.xlu0 %922  ;;  %v1130_v39 = vpop.xlane.xlu1 %1129 }
 0x29f   : > { %v928_v13 = vmul.f32 0.17677669, %v923_v9  ;;  %v1137_v42 = vmul.f32 0.17677669, %v1130_v39 }
 0x2a2   : > { %v1133_v21 = vpop.xlane.xlu0 %1132 }
 0x2a3   : > { %v1138_v26 = vmul.f32 0.17677669, %v1133_v21 }
 0x2ca   : > { %v1942_v45 = vpop.f32.mrf.mxu1 }
 0x2cc   : > { %v1539_v46 = vpop.f32.mrf.mxu1 }
 0x2ce   : > { %v1944_v47 = vpop.f32.mrf.mxu1 }
 0x2d0   : > { %v1540_v51 = vpop.f32.mrf.mxu1 }
 0x2d2   : > { %v689_v53 = vpop.f32.mrf.mxu1 }
 0x2d3   : > { %v715_v55 = vmul.f32 0.35355338, %v689_v53 }
 0x2d4   : > { %v1545_v56 = vpop.f32.mrf.mxu1 }
 0x2d5   : > { %v719_v59 = vsub.f32 %v715_v55, %v717_v52  ;;  %v1978_v55 = vstv %s937_s24 }
 0x2d6   : > { %v692_v62 = vpop.f32.mrf.mxu1  ;;  %v940_v56 = vmul.f32 %v1887_v49, %v1978_v55 }
 0x2d7   : > { %v716_v3 = vmul.f32 0.35355338, %v692_v62  ;;  %v1947_v4 = vadd.f32 %v1454_v58, %v719_v59 }
 0x2d8   : > { %v1546_v5 = vpop.f32.mrf.mxu1 }
 0x2d9   : > { %v720_v6 = vsub.f32 %v716_v3, %v718_v60  ;;  %v751_v7 = vsel %vm544_vm2, %v1947_v4, -inf  ;;  %v1985_v3 = vstv %s1147_s27 }
 0x2da   : > { %v899_v8 = vpop.f32.mrf.mxu1  ;;  %752 = vmax.xlane.f32.xlu1 %v751_v7  ;;  %v1150_v9 = vmul.f32 %v1887_v49, %v1985_v3 }
 0x2db   : > { %v1951_v10 = vadd.f32 %v1454_v58, %v720_v6  ;;  %v925_v36 = vmul.f32 0.35355338, %v899_v8  ;;  %v943_v58 = vmul.f32 1.442695, %v940_v56  ;;  %v1457_v8 = vsel %vm743_vm8, 1.0, %v1732_v0 }
 0x2dc   : > { %v1557_v12 = vpop.f32.mrf.mxu1 }
 0x2dd   : > { %v754_v14 = vsel %vm544_vm2, %v1951_v10, -inf  ;;  %v929_v40 = vsub.f32 %v925_v36, %v927_v37 }
 0x2de   : > { %v902_v15 = vpop.f32.mrf.mxu1  ;;  %755 = vmax.xlane.f32.xlu0 %v754_v14 }
 0x2df   : > { %v926_v16 = vmul.f32 0.35355338, %v902_v15  ;;  %v1967_v44 = vadd.f32 %v1466_v18, %v929_v40 }
 0x2e0   : > { %v1558_v17 = vpop.f32.mrf.mxu1 }
 0x2e1   : > { %v930_v19 = vsub.f32 %v926_v16, %v928_v13  ;;  %v1153_v13 = vmul.f32 1.442695, %v1150_v9  ;;  %v1456_v16 = vsel %vm738_vm9, 1.0, %v1732_v0  ;;  %v1458_v17 = vsel %vm744_vm10, 1.0, %v1732_v0 }
 0x2e2   : > { %v1109_v20 = vpop.f32.mrf.mxu1  ;;  %v1469_v9 = vsel %vm953_vm1, 1.0, %v1732_v0 }
 0x2e3   : > { %v1956_v22 = vadd.f32 %v1466_v18, %v930_v19  ;;  %v1135_v41 = vmul.f32 0.35355338, %v1109_v20 }
 0x2e4   : > { %v1569_v25 = vpop.f32.mrf.mxu1 }
 0x2e5   : > { %v964_v27 = vsel %vm544_vm2, %v1956_v22, -inf  ;;  %v1139_v43 = vsub.f32 %v1135_v41, %v1137_v42 }
 0x2e6   : > { %v1112_v28 = vpop.f32.mrf.mxu1  ;;  %965 = vmax.xlane.f32.xlu0 %v964_v27 }
 0x2e7   : > { %v1136_v29 = vmul.f32 0.35355338, %v1112_v28  ;;  %v1971_v46 = vadd.f32 %v1478_v30, %v1139_v43 }
 0x2e8   : > { %v1570_v31 = vpop.f32.mrf.mxu1 }
 0x2e9   : > { %v1140_v32 = vsub.f32 %v1136_v29, %v1138_v26  ;;  %v1171_v50 = vsel %vm544_vm2, %v1971_v46, -inf  ;;  %v1470_v31 = vsel %vm954_vm12, 1.0, %v1732_v0 }
 0x2eb   : > { %774 = vrot.lane.b32.xlu1 %v1870_v33, %s1742_s16  ;;  %v1962_v34 = vadd.f32 %v1478_v30, %v1140_v32  ;;  %v961_v33 = vsel %vm544_vm2, %v1967_v44, -inf  ;;  %v1468_v30 = vsel %vm948_vm11, 1.0, %v1732_v0 }
 0x2ec   : > { %v960_v40 = vadd.f32 %v1470_v31, %v1468_v30 }
 0x2ed   : > { %v1174_v35 = vsel %vm544_vm2, %v1962_v34, -inf }
 0x2ee   : > { %1175 = vmax.xlane.f32.xlu0 %v1174_v35 }
 0x304   : > { %984 = vrot.lane.b32.xlu0 %v1854_v11, %s1743_s17  ;;  %v728_v11 = vstv %s727_s20 }
 0x305   : > { %v729_v51 = vmul.f32 %v1885_v48, %v728_v11  ;;  %v730_v53 = vmul.f32 %v1887_v49, %v728_v11  ;;  %v750_v49 = vadd.f32 %v1458_v17, %v1456_v16  ;;  %v1482_v11 = vsel %vm1164_vm14, 1.0, %v1732_v0 }
 0x307   : > { %v731_v52 = vmul.f32 1.442695, %v729_v51  ;;  %v733_v54 = vmul.f32 1.442695, %v730_v53 }
 0x309   : > { %1648 = vpow2.f32 %v731_v52 }
 0x30a   : > { %1650 = vpow2.f32 %v733_v54 }
 0x30f   : > { %962 = vmax.xlane.f32.xlu1 %v961_v33 }
 0x313   : > { %1172 = vmax.xlane.f32.xlu1 %v1171_v50  ;;  %v1480_v50 = vsel %vm1158_vm13, 1.0, %v1732_v0 }
 0x314   : > { %v1170_v2 = vadd.f32 %v1482_v11, %v1480_v50 }
 0x316   : > { %v1649_v6 = vpop.eup %1648 }
 0x317   : > { %v735_v12 = vadd.f32 1e-06, %v1649_v6  ;;  %v1651_v14 = vpop.eup %1650 }
 0x318   : > { %v736_v21 = vadd.f32 1e-06, %v1651_v14 }
 0x31a   : > { %v764_v28 = vmul.f32 %v750_v49, %v736_v21 }
 0x324   : > { %1194 = vrot.lane.b32.xlu1 %v1877_v38, %s1744_s18 }
 0x363   : > { %v753_v38 = vpop.xlane.xlu1 %752 }
 0x364   : > { %v757_v57 = vsub.f32 %v1947_v4, %v753_v38  ;;  %v1455_v4 = vsel %vm737_vm7, 1.0, %v1732_v0 }
 0x366   : > { %v759_v59 = vmul.f32 1.442695, %v757_v57  ;;  %v939_v57 = vmul.f32 %v1885_v48, %v1978_v55 }
 0x367   : > { %v756_v60 = vpop.xlane.xlu0 %755  ;;  %v775_v62 = vpop.permute.xlu1 %774 }
 0x368   : > { %1652 = vpow2.f32 %v759_v59  ;;  %v758_v5 = vsub.f32 %v1951_v10, %v756_v60  ;;  %1548 = vmatpush3.bf16.msra.mxu0 %v775_v62  ;;  %v749_v10 = vadd.f32 %v1457_v8, %v1455_v4  ;;  %v941_v59 = vmul.f32 1.442695, %v939_v57 }
 0x369   : > { %1654 = vpow2.f32 %v943_v58  ;;  %1559 = vmatprep.subr.bf16.mxu0 %v1732_v0  ;;  %v1149_v60 = vmul.f32 %v1885_v48, %v1985_v3  ;;  %v564_v62 = vsel %vm544_vm2, %v1917_v24, 0.0  ;;  %v1467_v24 = vsel %vm947_vm15, 1.0, %v1732_v0 }
 0x36a   : > { %v761_v7 = vmul.f32 1.442695, %v758_v5  ;;  %v763_v19 = vmul.f32 %v749_v10, %v735_v12  ;;  %v959_v12 = vadd.f32 %v1469_v9, %v1467_v24 }
 0x36b   : > { %v1151_v5 = vmul.f32 1.442695, %v1149_v60 }
 0x36c   : > { %1656 = vpow2.f32 %v761_v7 }
 0x36d   : > { %1658 = vpow2.f32 %v1153_v13  ;;  %v1481_v13 = vsel %vm1163_vm4, 1.0, %v1732_v0 }
 0x36f   : > { %v966_v15 = vpop.xlane.xlu0 %965 }
 0x370   : > { %v968_v18 = vsub.f32 %v1956_v22, %v966_v15 }
 0x372   : > { %v971_v20 = vmul.f32 1.442695, %v968_v18 }
 0x374   : > { %1660 = vpow2.f32 %v971_v20 }
 0x375   : > { %v1653_v25 = vpop.eup %1652 }
 0x376   : > { %v1655_v26 = vpop.eup %1654  ;;  %v765_v27 = vmul.f32 %v1653_v25, %v763_v19 }
 0x377   : > { %v1176_v29 = vpop.xlane.xlu0 %1175  ;;  %v946_v39 = vadd.f32 1e-06, %v1655_v26 }
 0x378   : > { %v1178_v22 = vsub.f32 %v1962_v34, %v1176_v29  ;;  %v767_v32 = vsel %vm544_vm2, %v765_v27, 0.0 }
 0x379   : > { %v1657_v35 = vpop.eup %1656  ;;  %768 = vadd.xlane.f32.xlu1 %v767_v32  ;;  %v974_v34 = vmul.f32 %v960_v40, %v946_v39 }
 0x37a   : > { %v1181_v36 = vmul.f32 1.442695, %v1178_v22  ;;  %v766_v37 = vmul.f32 %v1657_v35, %v764_v28  ;;  %v1659_v33 = vpop.eup %1658 }
 0x37b   : > { %v985_v43 = vpop.permute.xlu0 %984  ;;  %v1156_v52 = vadd.f32 1e-06, %v1659_v33 }
 0x37c   : > { %1662 = vpow2.f32 %v1181_v36  ;;  %v770_v41 = vsel %vm544_vm2, %v766_v37, 0.0  ;;  %v773_v42 = vpack.c.bf16 %v766_v37, %v765_v27  ;;  %v561_v27 = vsel %vm544_vm2, %v1915_v23, 0.0 }
 0x37d   : > { %771 = vadd.xlane.f32.xlu0 %v770_v41  ;;  %v1184_v54 = vmul.f32 %v1170_v2, %v1156_v52  ;;  %1664 = vpow2.f32 %v941_v59 }
 0x37e   : > { %1550 = vmatmul.mubr.msk.bf16.vlgmr.msra.gmra.mxu0 %vm544_vm2, %v773_v42  ;;  %1666 = vpow2.f32 %v1151_v5 }
 0x37f   : > { %1560 = vmatpush3.bf16.msra.mxu0 %v985_v43  ;;  %1561 = vmatprep.mubr.msk.bf16.mxu0 %vm1733_vm0, %v1732_v0 }
 0x380   : > { %1571 = vmatprep.subr.bf16.mxu0 %v1732_v0 }
 0x381   : > { %v1661_v63 = vpop.eup %1660 }
 0x382   : > { %v976_v51 = vmul.f32 %v1661_v63, %v974_v34 }
 0x384   : > { %v980_v53 = vsel %vm544_vm2, %v976_v51, 0.0 }
 0x385   : > { %981 = vadd.xlane.f32.xlu1 %v980_v53 }
 0x389   : > { %v1663_v56 = vpop.eup %1662 }
 0x38a   : > { %v1186_v38 = vmul.f32 %v1663_v56, %v1184_v54  ;;  %v1665_v3 = vpop.eup %1664 }
 0x38b   : > { %v1667_v10 = vpop.eup %1666 }
 0x38c   : > { %v1190_v58 = vsel %vm544_vm2, %v1186_v38, 0.0  ;;  %v1155_v15 = vadd.f32 1e-06, %v1667_v10 }
 0x38d   : > { %1191 = vadd.xlane.f32.xlu1 %v1190_v58 }
 0x391   : > { %565 = vadd.xlane.f32.xlu1 %v564_v62 }
 0x398   : > { %v963_v6 = vpop.xlane.xlu1 %962 }
 0x399   : > { %v967_v7 = vsub.f32 %v1967_v44, %v963_v6  ;;  %v945_v44 = vadd.f32 1e-06, %v1665_v3 }
 0x39b   : > { %v969_v4 = vmul.f32 1.442695, %v967_v7  ;;  %v973_v14 = vmul.f32 %v959_v12, %v945_v44 }
 0x39c   : > { %v1173_v8 = vpop.xlane.xlu1 %1172 }
 0x39d   : > { %1668 = vpow2.f32 %v969_v4  ;;  %v1177_v55 = vsub.f32 %v1971_v46, %v1173_v8  ;;  %v1479_v46 = vsel %vm1157_vm3, 1.0, %v1732_v0 }
 0x39e   : > { %v1169_v16 = vadd.f32 %v1481_v13, %v1479_v46 }
 0x39f   : > { %v1179_v48 = vmul.f32 1.442695, %v1177_v55 }
 0x3a0   : > { %v1183_v19 = vmul.f32 %v1169_v16, %v1155_v15  ;;  %v1195_v49 = vpop.permute.xlu1 %1194 }
 0x3a1   : > { %1670 = vpow2.f32 %v1179_v48 }
 0x3aa   : > { %v1669_v17 = vpop.eup %1668 }
 0x3ab   : > { %v975_v18 = vmul.f32 %v1669_v17, %v973_v14 }
 0x3ad   : > { %v977_v20 = vsel %vm544_vm2, %v975_v18, 0.0  ;;  %v983_v21 = vpack.c.bf16 %v976_v51, %v975_v18 }
 0x3ae   : > { %v1671_v61 = vpop.eup %1670  ;;  %978 = vadd.xlane.f32.xlu0 %v977_v20 }
 0x3af   : > { %1562 = vmatmul.mubr.msk.bf16.vlgmr.msra.gmra.mxu0 %vm544_vm2, %v983_v21  ;;  %v1185_v1 = vmul.f32 %v1671_v61, %v1183_v19 }
 0x3b0   : > { %1572 = vmatpush3.bf16.msra.mxu0 %v1195_v49  ;;  %1573 = vmatprep.mubr.msk.bf16.mxu0 %vm1733_vm0, %v1732_v0  ;;  %vm627_vm0 = vcmask 60416  }
 0x3b1   : > { %v1187_v25 = vsel %vm544_vm2, %v1185_v1, 0.0  ;;  %v1193_v26 = vpack.c.bf16 %v1186_v38, %v1185_v1 }
 0x3b2   : > { %1188 = vadd.xlane.f32.xlu0 %v1187_v25 }
 0x3b6   : > { %562 = vadd.xlane.f32.xlu0 %v561_v27 }
 0x3b7   : > { %1574 = vmatmul.mubr.msk.bf16.vlgmr.msra.gmra.mxu0 %vm544_vm2, %v1193_v26  ;;  %vm837_vm2 = vcmask 126016  }
 0x402   : > { %v769_v28 = vpop.xlane.xlu1 %768 }
 0x406   : > { %v772_v23 = vpop.xlane.xlu0 %771 }
 0x40e   : > { %v982_v29 = vpop.xlane.xlu1 %981 }
 0x416   : > { %v1192_v30 = vpop.xlane.xlu1 %1191 }
 0x41a   : > { %v566_v31 = vpop.xlane.xlu1 %565 }
 0x41b   : > { %1672 = vrcp.f32 %v566_v31 }
 0x41c   : > { %1674 = vrcp.f32 %v769_v28 }
 0x41d   : > { %1676 = vrcp.f32 %v772_v23 }
 0x428   : > { %v1673_v22 = vpop.eup %1672 }
 0x429   : > { %v618_v32 = vmul.f32 %v1673_v22, %v1944_v47  ;;  %v1675_v37 = vpop.eup %1674 }
 0x42a   : > { %v1677_v43 = vpop.eup %1676 }
 0x42b   : > { %v1494_v0 = vpack.c.bf16 %v618_v32, %v618_v32 }
 0x42d   : > { %629 = vst.msk [vmem:[%s2044_s30 + $0x4] sm:$0xf] %vm627_vm0, %v1494_v0 }
 0x437   : > { %v979_v35 = vpop.xlane.xlu0 %978 }
 0x43b   : > { %v1189_v36 = vpop.xlane.xlu0 %1188 }
 0x43e   : > { %v814_v39 = vpop.f32.mrf.mxu0 }
 0x43f   : > { %v823_v40 = vmul.f32 %v1675_v37, %v814_v39  ;;  %v563_v47 = vpop.xlane.xlu0 %562 }
 0x440   : > { %1678 = vrcp.f32 %v563_v47  ;;  %v1551_v41 = vpop.f32.mrf.mxu0 }
 0x441   : > { %v1495_v42 = vpack.c.bf16 %v823_v40, %v823_v40  ;;  %1680 = vrcp.f32 %v979_v35 }
 0x442   : > { %v817_v34 = vpop.f32.mrf.mxu0  ;;  %1682 = vrcp.f32 %v982_v29 }
 0x443   : > { %v824_v33 = vmul.f32 %v1677_v43, %v817_v34  ;;  %831 = vrot.lane.b32.xlu0 %v1495_v42, %s1745_s9  ;;  %1684 = vrcp.f32 %v1189_v36 }
 0x444   : > { %v1552_v50 = vpop.f32.mrf.mxu0  ;;  %1686 = vrcp.f32 %v1192_v30 }
 0x445   : > { %v1496_v11 = vpack.c.bf16 %v824_v33, %v824_v33 }
 0x447   : > { %833 = vrot.lane.b32.xlu1 %v1496_v11, %s1745_s9 }
 0x44d   : > { %v1679_v63 = vpop.eup %1678 }
 0x44e   : > { %v617_v51 = vmul.f32 %v1679_v63, %v1942_v45  ;;  %v1681_v2 = vpop.eup %1680 }
 0x44f   : > { %v1683_v57 = vpop.eup %1682 }
 0x450   : > { %v1493_v52 = vpack.c.bf16 %v617_v51, %v617_v51  ;;  %v1685_v45 = vpop.eup %1684 }
 0x451   : > { %v1687_v8 = vpop.eup %1686 }
 0x452   : > { %628 = vst.msk [vmem:[%s2044_s30] sm:$0xf] %vm627_vm0, %v1493_v52 }
 0x46f   : > { %v1024_v53 = vpop.f32.mrf.mxu0 }
 0x470   : > { %v1033_v54 = vmul.f32 %v1681_v2, %v1024_v53 }
 0x471   : > { %v1563_v56 = vpop.f32.mrf.mxu0 }
 0x472   : > { %v1497_v38 = vpack.c.bf16 %v1033_v54, %v1033_v54 }
 0x473   : > { %v1027_v58 = vpop.f32.mrf.mxu0 }
 0x474   : > { %v1034_v59 = vmul.f32 %v1683_v57, %v1027_v58  ;;  %1041 = vrot.lane.b32.xlu1 %v1497_v38, %s1746_s7 }
 0x475   : > { %v1564_v60 = vpop.f32.mrf.mxu0 }
 0x476   : > { %v1498_v62 = vpack.c.bf16 %v1034_v59, %v1034_v59 }
 0x477   : > { %v1234_v5 = vpop.f32.mrf.mxu0 }
 0x478   : > { %v1243_v6 = vmul.f32 %v1685_v45, %v1234_v5  ;;  %1043 = vrot.lane.b32.xlu0 %v1498_v62, %s1746_s7 }
 0x479   : > { %v1575_v7 = vpop.f32.mrf.mxu0 }
 0x47a   : > { %v1499_v4 = vpack.c.bf16 %v1243_v6, %v1243_v6 }
 0x47b   : > { %v1237_v55 = vpop.f32.mrf.mxu0 }
 0x47c   : > { %v1244_v48 = vmul.f32 %v1687_v8, %v1237_v55  ;;  %1251 = vrot.lane.b32.xlu1 %v1499_v4, %s1747_s8 }
 0x47d   : > { %v1576_v3 = vpop.f32.mrf.mxu0 }
 0x47e   : > { %v1500_v24 = vpack.c.bf16 %v1244_v48, %v1244_v48 }
 0x480   : > { %1253 = vrot.lane.b32.xlu0 %v1500_v24, %s1747_s8 }
 0x4b5   : > { %v832_v9 = vpop.permute.xlu0 %831 }
 0x4b6   : > { %838 = vst.msk [vmem:[%s2044_s30] sm:$0xf] %vm837_vm2, %v832_v9 }
 0x4b9   : > { %v834_v44 = vpop.permute.xlu1 %833 }
 0x4ba   : > { %839 = vst.msk [vmem:[%s2044_s30 + $0x4] sm:$0xf] %vm837_vm2, %v834_v44 }
 0x4e6   : > { %v1042_v12 = vpop.permute.xlu1 %1041 }
 0x4e7   : > { %1048 = vst.msk [vmem:[%s2044_s30] sm:$0xf] %vm1047_vm5, %v1042_v12 }
 0x4ea   : > { %v1044_v10 = vpop.permute.xlu0 %1043 }
 0x4eb   : > { %1049 = vst.msk [vmem:[%s2044_s30 + $0x4] sm:$0xf] %vm1047_vm5, %v1044_v10 }
 0x4ee   : > { %v1252_v46 = vpop.permute.xlu1 %1251 }
 0x4ef   : > { %1258 = vst.msk [vmem:[%s2044_s30] sm:$0xf] %vm1257_vm6, %v1252_v46 }
 0x4f2   : > { %v1254_v13 = vpop.permute.xlu0 %1253 }
 0x4f3   : > { %1259 = vst.msk [vmem:[%s2044_s30 + $0x4] sm:$0xf] %vm1257_vm6, %v1254_v13 }
 0x4f4 PF: > { %s17_s23 = sadd.s32 1, %s1729_s23   ;;  %s2075_s21 = smov %s1725_s22 }
 0x4f5   : > { %p14_p2 = scmp.ge.s32.totalorder %s17_s23, 4   ;;  %s2076_s22 = smov %s2078_s25 }
 0x4f7   :  { %16 = sbr.rel (!%p14_p2) target bundleno = 2 (0x2), region = 92 }
 0x4fc   :  { %1290 = vsyncpa [#allocation3], 1 }
 0x4fd   :  { %1292 = vsyncpa [#allocation3 + $0x1], 1 }

</bundles_post_ra>
